<compile_context>
chip_gen: v7x
topology: tpu7x:2x2x1
jax: 0.10.0
libtpu: 0.0.40
codegen_flags: <defaults>
</compile_context>

<pallas_src>
import jax
import jax.numpy as jnp
from jax import lax
from jax.experimental import pallas as pl
from jax.experimental.pallas import tpu as pltpu

C_HID = 32               # c_ in the PyTorch module
POOL_KS = (5, 9, 13)     # K in the PyTorch module
BN_EPS = 1e-5


def _silu(x):
    return x * jax.nn.sigmoid(x)


def _fold_bn(gamma, beta, mean, var):
    """Inference-mode BN as per-channel (scale, bias)."""
    scale = gamma / jnp.sqrt(var + BN_EPS)
    return scale, beta - mean * scale


def _block_diag(w, width):
    """(cin, cout) -> (width*cin, width*cout) block-diagonal replication so a
    1x1 conv applies directly to a lane-dense (H, W*cin) slab."""
    cin, cout = w.shape
    eye = jnp.eye(width, dtype=w.dtype)
    return (eye[:, None, :, None] * w[None, :, None, :]).reshape(
        width * cin, width * cout)


def spp_kernel(x_ref, w1_ref, b1_ref, w2_ref, b2_ref, o_ref, pad_ref):
    # x_ref  : (1, H, W*C1)       f32   lane-dense input tile
    # w1_ref : (W*C1, W*C_HID)    bf16  block-diag conv1 weight (BN scale folded)
    # b1_ref : (1, W*C_HID)       f32   conv1 folded-BN bias (tiled over W)
    # w2_ref : (4, W*C_HID, W*C2) bf16  block-diag conv2 weight per SPP branch
    # b2_ref : (1, W*C2)          f32   conv2 folded-BN bias (tiled over W)
    # o_ref  : (1, H, W*C2)       f32   lane-dense output tile
    # pad_ref: (H+8, W*C_HID)     f32   -inf padded scratch for row pooling
    _, H, _ = x_ref.shape
    WCH = b1_ref.shape[-1]
    NEG_INF = jnp.float32(-jnp.inf)

    # ---- conv1 (1x1) + folded BN + SiLU in the fat (H, W*C) layout ---------
    y = jnp.dot(x_ref[0].astype(jnp.bfloat16), w1_ref[...],
                preferred_element_type=jnp.float32)
    y = _silu(y + b1_ref[...])                        # (H, WCH) f32

    # ---- hoisted pooling edge masks (built once, reused by all 3 pools) ----
    col = lax.broadcasted_iota(jnp.int32, (1, WCH), 1)
    col_shifts = (-2 * C_HID, -C_HID, C_HID, 2 * C_HID)
    col_masks = tuple(
        jnp.where((col + d >= 0) & (col + d < WCH), 0.0, NEG_INF)
        for d in col_shifts)

    # -inf border rows; each pool5 call overwrites rows [2, 2+H) with its slab.
    pad_ref[...] = jnp.full(pad_ref.shape, NEG_INF, pad_ref.dtype)

    def pool5(a):
        """Separable 5x5, stride-1, 'same' (-inf padded) max pool on (H, W*C)."""
        # Rows: write to the -inf padded scratch, read back at static sublane
        # offsets (vld path) instead of XLU rolls + masked selects.
        pad_ref[pl.ds(2, H), :] = a
        r = a
        for d in (0, 1, 3, 4):                    # row offsets -2,-1,+1,+2
            r = jnp.maximum(r, pad_ref[pl.ds(d, H), :])
        # Columns: lane rolls by multiples of C_HID (XLU) + additive edge mask.
        out = r
        for d, m in zip(col_shifts, col_masks):
            out = jnp.maximum(out, pltpu.roll(r, (-d) % WCH, 1) + m)
        return out

    # ---- pooling cascade interleaved with concat-free conv2 accumulation ---
    # pool9 = pool5∘pool5, pool13 = pool5∘pool5∘pool5 (exact for stride 1 and
    # -inf padding), so only three pool5 passes are needed.
    def branch_dot(a, i):
        return jnp.dot(a.astype(jnp.bfloat16), w2_ref[i],
                       preferred_element_type=jnp.float32)

    z = branch_dot(y, 0)
    p = pool5(y)                      # 5x5
    z += branch_dot(p, 1)
    p = pool5(p)                      # 9x9
    z += branch_dot(p, 2)
    p = pool5(p)                      # 13x13
    z += branch_dot(p, 3)

    o_ref[0] = _silu(z + b2_ref[...])                 # (H, W*C2), lane-dense


def spp_forward(x, w1, g1, be1, mu1, va1, w2, g2, be2, mu2, va2):
    """SPP forward.  x: (N, H, W, C1) NHWC (the torch NCHW input moved to
    channels-last).  w1: (C1, 32), w2: (128, C2); g/be/mu/va are BN params."""
    N, H, W, C1 = x.shape
    C2 = w2.shape[1]
    n_branch = len(POOL_KS) + 1
    assert w2.shape[0] == n_branch * C_HID

    # Fold the inference BatchNorms: scale into the weights, bias stays (f32).
    s1, b1 = _fold_bn(g1, be1, mu1, va1)
    s2, b2 = _fold_bn(g2, be2, mu2, va2)
    w1f = w1 * s1[None, :]                           # (C1, C_HID)
    w2f = w2 * s2[None, :]                           # (4*C_HID, C2)

    # Lane-dense presentation + block-diagonal bf16 weights: the kernel only
    # ever sees (H, W*C) slabs (no relayout / channel concat), and the
    # dominant conv2 weight DMA + VMEM footprint is halved by the bf16 cast.
    w1_fat = _block_diag(w1f, W).astype(jnp.bfloat16)               # (W*C1, W*CH)
    w2_fat = jnp.stack(
        [_block_diag(w2f[i * C_HID:(i + 1) * C_HID], W)
         for i in range(n_branch)]).astype(jnp.bfloat16)            # (4, W*CH, W*C2)
    b1_fat = jnp.tile(b1, W)[None, :].astype(jnp.float32)           # (1, W*CH)
    b2_fat = jnp.tile(b2, W)[None, :].astype(jnp.float32)           # (1, W*C2)
    x_fat = x.reshape(N, H, W * C1)

    WCH, WC2 = W * C_HID, W * C2

    out_fat = pl.pallas_call(
        spp_kernel,
        out_shape=jax.ShapeDtypeStruct((N, H, WC2), jnp.float32),
        grid_spec=pltpu.PrefetchScalarGridSpec(
            num_scalar_prefetch=0,
            grid=(N,),
            in_specs=[
                pl.BlockSpec((1, H, W * C1), lambda n: (n, 0, 0)),
                pl.BlockSpec((W * C1, WCH), lambda n: (0, 0)),
                pl.BlockSpec((1, WCH), lambda n: (0, 0)),
                pl.BlockSpec((n_branch, WCH, WC2), lambda n: (0, 0, 0)),
                pl.BlockSpec((1, WC2), lambda n: (0, 0)),
            ],
            out_specs=pl.BlockSpec((1, H, WC2), lambda n: (n, 0, 0)),
            scratch_shapes=[pltpu.VMEM((H + 8, WCH), jnp.float32)],
        ),
        compiler_params=pltpu.CompilerParams(
            dimension_semantics=("parallel",),
            vmem_limit_bytes=32 * 1024 * 1024),
    )(x_fat, w1_fat, b1_fat, w2_fat, b2_fat)
    return out_fat.reshape(N, H, W, C2)


def _ref_forward(x, w1, g1, be1, mu1, va1, w2, g2, be2, mu2, va2):
    """Pure-JAX NHWC reference mirroring the PyTorch forward (inference BN)."""
    def bn(t, g, b, mu, va):
        return (t - mu) * (g / jnp.sqrt(va + BN_EPS)) + b

    hi = lax.Precision.HIGHEST
    y = _silu(bn(jnp.einsum('nhwc,cd->nhwd', x, w1, precision=hi),
                 g1, be1, mu1, va1))
    feats = [y]
    for k in POOL_KS:
        p = k // 2
        feats.append(lax.reduce_window(
            y, -jnp.inf, lax.max,
            window_dimensions=(1, k, k, 1), window_strides=(1, 1, 1, 1),
            padding=[(0, 0), (p, p), (p, p), (0, 0)]))
    cat = jnp.concatenate(feats, axis=-1)
    return _silu(bn(jnp.einsum('nhwc,cd->nhwd', cat, w2, precision=hi),
                    g2, be2, mu2, va2))


if __name__ == "__main__":
    N, C1, H, W, C2 = 2, 4, 16, 16, 8
    key = jax.random.PRNGKey(0)
    ks = jax.random.split(key, 12)

    # NHWC input (== the torch NCHW input [2, 4, 16, 16] transposed).
    x = jax.random.normal(ks[0], (N, H, W, C1), jnp.float32)

    # conv1: 1x1, c1 -> 32, no bias ; BatchNorm2d(32) inference params
    w1 = 0.3 * jax.random.normal(ks[1], (C1, C_HID), jnp.float32)
    g1 = 1.0 + 0.1 * jax.random.normal(ks[2], (C_HID,), jnp.float32)
    be1 = 0.1 * jax.random.normal(ks[3], (C_HID,), jnp.float32)
    mu1 = 0.05 * jax.random.normal(ks[4], (C_HID,), jnp.float32)
    va1 = 1.0 + 0.1 * jnp.abs(jax.random.normal(ks[5], (C_HID,), jnp.float32))

    # conv2: 1x1, 128 -> c2, no bias ; BatchNorm2d(c2) inference params
    c_cat = C_HID * (len(POOL_KS) + 1)
    w2 = 0.1 * jax.random.normal(ks[6], (c_cat, C2), jnp.float32)
    g2 = 1.0 + 0.1 * jax.random.normal(ks[7], (C2,), jnp.float32)
    be2 = 0.1 * jax.random.normal(ks[8], (C2,), jnp.float32)
    mu2 = 0.05 * jax.random.normal(ks[9], (C2,), jnp.float32)
    va2 = 1.0 + 0.1 * jnp.abs(jax.random.normal(ks[10], (C2,), jnp.float32))

    out = jax.block_until_ready(
        spp_forward(x, w1, g1, be1, mu1, va1, w2, g2, be2, mu2, va2))

    ref = _ref_forward(x, w1, g1, be1, mu1, va1, w2, g2, be2, mu2, va2)
    assert out.shape == (N, H, W, C2)
    err = float(jnp.max(jnp.abs(out - ref)))
    # bf16 weights / bf16 matmul operands (f32 accumulation) vs an f32
    # HIGHEST-precision reference -> tolerance ~1e-2 (as per the perf review).
    assert jnp.allclose(out, ref, atol=2e-2, rtol=2e-2), err
    print("KERNEL_OK")
</pallas_src>

<mosaic_0001>
module attributes {stable_mosaic.version = 11 : i64} {
  func.func @spp_kernel(%arg0: i32, %arg1: memref<1x16x64xf32, #tpu.memory_space<vmem>>, %arg2: memref<64x512xbf16, #tpu.memory_space<vmem>>, %arg3: memref<1x512xf32, #tpu.memory_space<vmem>>, %arg4: memref<4x512x128xbf16, #tpu.memory_space<vmem>>, %arg5: memref<1x128xf32, #tpu.memory_space<vmem>>, %arg6: memref<1x16x128xf32, #tpu.memory_space<vmem>>, %arg7: memref<24x512xf32, #tpu.memory_space<vmem>>) attributes {dimension_semantics = [#tpu.dimension_semantics<parallel>], iteration_bounds = array<i64: 2>, scalar_prefetch = 0 : i64, scratch_operands = 1 : i64, tpu.core_type = #tpu.core_type<tc>, window_params = [{transform_indices = @transform_0, window_bounds = array<i64: 1, 16, 64>}, {pipeline_mode = #tpu.pipeline_mode<synchronous>, transform_indices = @transform_1, window_bounds = array<i64: 64, 512>}, {pipeline_mode = #tpu.pipeline_mode<synchronous>, transform_indices = @transform_2, window_bounds = array<i64: 1, 512>}, {pipeline_mode = #tpu.pipeline_mode<synchronous>, transform_indices = @transform_3, window_bounds = array<i64: 4, 512, 128>}, {pipeline_mode = #tpu.pipeline_mode<synchronous>, transform_indices = @transform_4, window_bounds = array<i64: 1, 128>}, {transform_indices = @transform_5, window_bounds = array<i64: 1, 16, 128>}]} {
    %c0 = arith.constant 0 : index
    %c0_0 = arith.constant 0 : index
    %c0_1 = arith.constant 0 : index
    %0 = vector.load %arg1[%c0, %c0_0, %c0_1] : memref<1x16x64xf32, #tpu.memory_space<vmem>>, vector<1x16x64xf32>
    %1 = vector.shape_cast %0 : vector<1x16x64xf32> to vector<16x64xf32>
    %2 = arith.truncf %1 : vector<16x64xf32> to vector<16x64xbf16>
    %c0_2 = arith.constant 0 : index
    %c0_3 = arith.constant 0 : index
    %3 = vector.load %arg2[%c0_2, %c0_3] : memref<64x512xbf16, #tpu.memory_space<vmem>>, vector<64x512xbf16>
    %cst = arith.constant dense<0.000000e+00> : vector<16x512xf32>
    %4 = tpu.matmul %2, %3, %cst {dimension_numbers = #tpu.dot_dimension_numbers<[1], [0], [0], [1], [0, 0, 1, 1], [], []>} : vector<16x64xbf16>, vector<64x512xbf16>, vector<16x512xf32> -> vector<16x512xf32>
    %c0_4 = arith.constant 0 : index
    %c0_5 = arith.constant 0 : index
    %5 = vector.load %arg3[%c0_4, %c0_5] : memref<1x512xf32, #tpu.memory_space<vmem>>, vector<1x512xf32>
    %6 = vector.broadcast %5 : vector<1x512xf32> to vector<16x512xf32>
    %7 = arith.addf %4, %6 : vector<16x512xf32>
    %8 = arith.negf %7 : vector<16x512xf32>
    %9 = math.exp %8 : vector<16x512xf32>
    %cst_6 = arith.constant 1.000000e+00 : f32
    %10 = vector.broadcast %cst_6 : f32 to vector<16x512xf32>
    %11 = arith.addf %10, %9 : vector<16x512xf32>
    %12 = arith.divf %10, %11 : vector<16x512xf32>
    %13 = arith.mulf %7, %12 : vector<16x512xf32>
    %14 = tpu.iota {dimensions = array<i32: 1>} : vector<1x512xi32>
    %c-64_i32 = arith.constant -64 : i32
    %15 = vector.broadcast %c-64_i32 : i32 to vector<1x512xi32>
    %16 = arith.addi %14, %15 : vector<1x512xi32>
    %c0_i32 = arith.constant 0 : i32
    %17 = vector.broadcast %c0_i32 : i32 to vector<1x512xi32>
    %18 = arith.cmpi sge, %16, %17 : vector<1x512xi32>
    %c-64_i32_7 = arith.constant -64 : i32
    %19 = vector.broadcast %c-64_i32_7 : i32 to vector<1x512xi32>
    %20 = arith.addi %14, %19 : vector<1x512xi32>
    %c512_i32 = arith.constant 512 : i32
    %21 = vector.broadcast %c512_i32 : i32 to vector<1x512xi32>
    %22 = arith.cmpi slt, %20, %21 : vector<1x512xi32>
    %23 = arith.andi %18, %22 : vector<1x512xi1>
    %cst_8 = arith.constant 0.000000e+00 : f32
    %cst_9 = arith.constant 0xFF800000 : f32
    %24 = vector.broadcast %cst_8 : f32 to vector<1x512xf32>
    %25 = vector.broadcast %cst_9 : f32 to vector<1x512xf32>
    %26 = arith.select %23, %24, %25 : vector<1x512xi1>, vector<1x512xf32>
    %c-32_i32 = arith.constant -32 : i32
    %27 = vector.broadcast %c-32_i32 : i32 to vector<1x512xi32>
    %28 = arith.addi %14, %27 : vector<1x512xi32>
    %c0_i32_10 = arith.constant 0 : i32
    %29 = vector.broadcast %c0_i32_10 : i32 to vector<1x512xi32>
    %30 = arith.cmpi sge, %28, %29 : vector<1x512xi32>
    %c-32_i32_11 = arith.constant -32 : i32
    %31 = vector.broadcast %c-32_i32_11 : i32 to vector<1x512xi32>
    %32 = arith.addi %14, %31 : vector<1x512xi32>
    %c512_i32_12 = arith.constant 512 : i32
    %33 = vector.broadcast %c512_i32_12 : i32 to vector<1x512xi32>
    %34 = arith.cmpi slt, %32, %33 : vector<1x512xi32>
    %35 = arith.andi %30, %34 : vector<1x512xi1>
    %cst_13 = arith.constant 0.000000e+00 : f32
    %cst_14 = arith.constant 0xFF800000 : f32
    %36 = vector.broadcast %cst_13 : f32 to vector<1x512xf32>
    %37 = vector.broadcast %cst_14 : f32 to vector<1x512xf32>
    %38 = arith.select %35, %36, %37 : vector<1x512xi1>, vector<1x512xf32>
    %c32_i32 = arith.constant 32 : i32
    %39 = vector.broadcast %c32_i32 : i32 to vector<1x512xi32>
    %40 = arith.addi %14, %39 : vector<1x512xi32>
    %c0_i32_15 = arith.constant 0 : i32
    %41 = vector.broadcast %c0_i32_15 : i32 to vector<1x512xi32>
    %42 = arith.cmpi sge, %40, %41 : vector<1x512xi32>
    %c32_i32_16 = arith.constant 32 : i32
    %43 = vector.broadcast %c32_i32_16 : i32 to vector<1x512xi32>
    %44 = arith.addi %14, %43 : vector<1x512xi32>
    %c512_i32_17 = arith.constant 512 : i32
    %45 = vector.broadcast %c512_i32_17 : i32 to vector<1x512xi32>
    %46 = arith.cmpi slt, %44, %45 : vector<1x512xi32>
    %47 = arith.andi %42, %46 : vector<1x512xi1>
    %cst_18 = arith.constant 0.000000e+00 : f32
    %cst_19 = arith.constant 0xFF800000 : f32
    %48 = vector.broadcast %cst_18 : f32 to vector<1x512xf32>
    %49 = vector.broadcast %cst_19 : f32 to vector<1x512xf32>
    %50 = arith.select %47, %48, %49 : vector<1x512xi1>, vector<1x512xf32>
    %c64_i32 = arith.constant 64 : i32
    %51 = vector.broadcast %c64_i32 : i32 to vector<1x512xi32>
    %52 = arith.addi %14, %51 : vector<1x512xi32>
    %c0_i32_20 = arith.constant 0 : i32
    %53 = vector.broadcast %c0_i32_20 : i32 to vector<1x512xi32>
    %54 = arith.cmpi sge, %52, %53 : vector<1x512xi32>
    %c64_i32_21 = arith.constant 64 : i32
    %55 = vector.broadcast %c64_i32_21 : i32 to vector<1x512xi32>
    %56 = arith.addi %14, %55 : vector<1x512xi32>
    %c512_i32_22 = arith.constant 512 : i32
    %57 = vector.broadcast %c512_i32_22 : i32 to vector<1x512xi32>
    %58 = arith.cmpi slt, %56, %57 : vector<1x512xi32>
    %59 = arith.andi %54, %58 : vector<1x512xi1>
    %cst_23 = arith.constant 0.000000e+00 : f32
    %cst_24 = arith.constant 0xFF800000 : f32
    %60 = vector.broadcast %cst_23 : f32 to vector<1x512xf32>
    %61 = vector.broadcast %cst_24 : f32 to vector<1x512xf32>
    %62 = arith.select %59, %60, %61 : vector<1x512xi1>, vector<1x512xf32>
    %cst_25 = arith.constant 0xFF800000 : f32
    %63 = vector.broadcast %cst_25 : f32 to vector<24x512xf32>
    %c0_26 = arith.constant 0 : index
    %c0_27 = arith.constant 0 : index
    %64 = vector.load %arg7[%c0_26, %c0_27] : memref<24x512xf32, #tpu.memory_space<vmem>>, vector<24x512xf32>
    tpu.vector_store %arg7[%c0_26, %c0_27], %63 {strides = array<i32>} : memref<24x512xf32, #tpu.memory_space<vmem>>, vector<24x512xf32>,
    %65 = arith.truncf %13 : vector<16x512xf32> to vector<16x512xbf16>
    %c0_28 = arith.constant 0 : index
    %c0_29 = arith.constant 0 : index
    %c0_30 = arith.constant 0 : index
    %66 = vector.load %arg4[%c0_28, %c0_29, %c0_30] : memref<4x512x128xbf16, #tpu.memory_space<vmem>>, vector<1x512x128xbf16>
    %67 = vector.shape_cast %66 : vector<1x512x128xbf16> to vector<512x128xbf16>
    %cst_31 = arith.constant dense<0.000000e+00> : vector<16x128xf32>
    %68 = tpu.matmul %65, %67, %cst_31 {dimension_numbers = #tpu.dot_dimension_numbers<[1], [0], [0], [1], [0, 0, 1, 1], [], []>} : vector<16x512xbf16>, vector<512x128xbf16>, vector<16x128xf32> -> vector<16x128xf32>
    %c2 = arith.constant 2 : index
    %c0_32 = arith.constant 0 : index
    %69 = vector.load %arg7[%c2, %c0_32] : memref<24x512xf32, #tpu.memory_space<vmem>>, vector<16x512xf32>
    tpu.vector_store %arg7[%c2, %c0_32], %13 {strides = array<i32>} : memref<24x512xf32, #tpu.memory_space<vmem>>, vector<16x512xf32>,
    %c0_33 = arith.constant 0 : index
    %c0_34 = arith.constant 0 : index
    %70 = vector.load %arg7[%c0_33, %c0_34] : memref<24x512xf32, #tpu.memory_space<vmem>>, vector<16x512xf32>
    %71 = arith.maximumf %13, %70 : vector<16x512xf32>
    %c1 = arith.constant 1 : index
    %c0_35 = arith.constant 0 : index
    %72 = vector.load %arg7[%c1, %c0_35] : memref<24x512xf32, #tpu.memory_space<vmem>>, vector<16x512xf32>
    %73 = arith.maximumf %71, %72 : vector<16x512xf32>
    %c3 = arith.constant 3 : index
    %c0_36 = arith.constant 0 : index
    %74 = vector.load %arg7[%c3, %c0_36] : memref<24x512xf32, #tpu.memory_space<vmem>>, vector<16x512xf32>
    %75 = arith.maximumf %73, %74 : vector<16x512xf32>
    %c4 = arith.constant 4 : index
    %c0_37 = arith.constant 0 : index
    %76 = vector.load %arg7[%c4, %c0_37] : memref<24x512xf32, #tpu.memory_space<vmem>>, vector<16x512xf32>
    %77 = arith.maximumf %75, %76 : vector<16x512xf32>
    %c64_i32_38 = arith.constant 64 : i32
    %78 = tpu.dynamic_rotate %77 by %c64_i32_38 dim 1 : vector<16x512xf32>, i32 -> vector<16x512xf32>
    %79 = vector.broadcast %26 : vector<1x512xf32> to vector<16x512xf32>
    %80 = arith.addf %78, %79 : vector<16x512xf32>
    %81 = arith.maximumf %77, %80 : vector<16x512xf32>
    %c32_i32_39 = arith.constant 32 : i32
    %82 = tpu.dynamic_rotate %77 by %c32_i32_39 dim 1 : vector<16x512xf32>, i32 -> vector<16x512xf32>
    %83 = vector.broadcast %38 : vector<1x512xf32> to vector<16x512xf32>
    %84 = arith.addf %82, %83 : vector<16x512xf32>
    %85 = arith.maximumf %81, %84 : vector<16x512xf32>
    %c480_i32 = arith.constant 480 : i32
    %86 = tpu.dynamic_rotate %77 by %c480_i32 dim 1 : vector<16x512xf32>, i32 -> vector<16x512xf32>
    %87 = vector.broadcast %50 : vector<1x512xf32> to vector<16x512xf32>
    %88 = arith.addf %86, %87 : vector<16x512xf32>
    %89 = arith.maximumf %85, %88 : vector<16x512xf32>
    %c448_i32 = arith.constant 448 : i32
    %90 = tpu.dynamic_rotate %77 by %c448_i32 dim 1 : vector<16x512xf32>, i32 -> vector<16x512xf32>
    %91 = vector.broadcast %62 : vector<1x512xf32> to vector<16x512xf32>
    %92 = arith.addf %90, %91 : vector<16x512xf32>
    %93 = arith.maximumf %89, %92 : vector<16x512xf32>
    %94 = arith.truncf %93 : vector<16x512xf32> to vector<16x512xbf16>
    %c1_40 = arith.constant 1 : index
    %c0_41 = arith.constant 0 : index
    %c0_42 = arith.constant 0 : index
    %95 = vector.load %arg4[%c1_40, %c0_41, %c0_42] : memref<4x512x128xbf16, #tpu.memory_space<vmem>>, vector<1x512x128xbf16>
    %96 = vector.shape_cast %95 : vector<1x512x128xbf16> to vector<512x128xbf16>
    %cst_43 = arith.constant dense<0.000000e+00> : vector<16x128xf32>
    %97 = tpu.matmul %94, %96, %cst_43 {dimension_numbers = #tpu.dot_dimension_numbers<[1], [0], [0], [1], [0, 0, 1, 1], [], []>} : vector<16x512xbf16>, vector<512x128xbf16>, vector<16x128xf32> -> vector<16x128xf32>
    %98 = arith.addf %68, %97 : vector<16x128xf32>
    %c2_44 = arith.constant 2 : index
    %c0_45 = arith.constant 0 : index
    %99 = vector.load %arg7[%c2_44, %c0_45] : memref<24x512xf32, #tpu.memory_space<vmem>>, vector<16x512xf32>
    tpu.vector_store %arg7[%c2_44, %c0_45], %93 {strides = array<i32>} : memref<24x512xf32, #tpu.memory_space<vmem>>, vector<16x512xf32>,
    %c0_46 = arith.constant 0 : index
    %c0_47 = arith.constant 0 : index
    %100 = vector.load %arg7[%c0_46, %c0_47] : memref<24x512xf32, #tpu.memory_space<vmem>>, vector<16x512xf32>
    %101 = arith.maximumf %93, %100 : vector<16x512xf32>
    %c1_48 = arith.constant 1 : index
    %c0_49 = arith.constant 0 : index
    %102 = vector.load %arg7[%c1_48, %c0_49] : memref<24x512xf32, #tpu.memory_space<vmem>>, vector<16x512xf32>
    %103 = arith.maximumf %101, %102 : vector<16x512xf32>
    %c3_50 = arith.constant 3 : index
    %c0_51 = arith.constant 0 : index
    %104 = vector.load %arg7[%c3_50, %c0_51] : memref<24x512xf32, #tpu.memory_space<vmem>>, vector<16x512xf32>
    %105 = arith.maximumf %103, %104 : vector<16x512xf32>
    %c4_52 = arith.constant 4 : index
    %c0_53 = arith.constant 0 : index
    %106 = vector.load %arg7[%c4_52, %c0_53] : memref<24x512xf32, #tpu.memory_space<vmem>>, vector<16x512xf32>
    %107 = arith.maximumf %105, %106 : vector<16x512xf32>
    %c64_i32_54 = arith.constant 64 : i32
    %108 = tpu.dynamic_rotate %107 by %c64_i32_54 dim 1 : vector<16x512xf32>, i32 -> vector<16x512xf32>
    %109 = vector.broadcast %26 : vector<1x512xf32> to vector<16x512xf32>
    %110 = arith.addf %108, %109 : vector<16x512xf32>
    %111 = arith.maximumf %107, %110 : vector<16x512xf32>
    %c32_i32_55 = arith.constant 32 : i32
    %112 = tpu.dynamic_rotate %107 by %c32_i32_55 dim 1 : vector<16x512xf32>, i32 -> vector<16x512xf32>
    %113 = vector.broadcast %38 : vector<1x512xf32> to vector<16x512xf32>
    %114 = arith.addf %112, %113 : vector<16x512xf32>
    %115 = arith.maximumf %111, %114 : vector<16x512xf32>
    %c480_i32_56 = arith.constant 480 : i32
    %116 = tpu.dynamic_rotate %107 by %c480_i32_56 dim 1 : vector<16x512xf32>, i32 -> vector<16x512xf32>
    %117 = vector.broadcast %50 : vector<1x512xf32> to vector<16x512xf32>
    %118 = arith.addf %116, %117 : vector<16x512xf32>
    %119 = arith.maximumf %115, %118 : vector<16x512xf32>
    %c448_i32_57 = arith.constant 448 : i32
    %120 = tpu.dynamic_rotate %107 by %c448_i32_57 dim 1 : vector<16x512xf32>, i32 -> vector<16x512xf32>
    %121 = vector.broadcast %62 : vector<1x512xf32> to vector<16x512xf32>
    %122 = arith.addf %120, %121 : vector<16x512xf32>
    %123 = arith.maximumf %119, %122 : vector<16x512xf32>
    %124 = arith.truncf %123 : vector<16x512xf32> to vector<16x512xbf16>
    %c2_58 = arith.constant 2 : index
    %c0_59 = arith.constant 0 : index
    %c0_60 = arith.constant 0 : index
    %125 = vector.load %arg4[%c2_58, %c0_59, %c0_60] : memref<4x512x128xbf16, #tpu.memory_space<vmem>>, vector<1x512x128xbf16>
    %126 = vector.shape_cast %125 : vector<1x512x128xbf16> to vector<512x128xbf16>
    %cst_61 = arith.constant dense<0.000000e+00> : vector<16x128xf32>
    %127 = tpu.matmul %124, %126, %cst_61 {dimension_numbers = #tpu.dot_dimension_numbers<[1], [0], [0], [1], [0, 0, 1, 1], [], []>} : vector<16x512xbf16>, vector<512x128xbf16>, vector<16x128xf32> -> vector<16x128xf32>
    %128 = arith.addf %98, %127 : vector<16x128xf32>
    %c2_62 = arith.constant 2 : index
    %c0_63 = arith.constant 0 : index
    %129 = vector.load %arg7[%c2_62, %c0_63] : memref<24x512xf32, #tpu.memory_space<vmem>>, vector<16x512xf32>
    tpu.vector_store %arg7[%c2_62, %c0_63], %123 {strides = array<i32>} : memref<24x512xf32, #tpu.memory_space<vmem>>, vector<16x512xf32>,
    %c0_64 = arith.constant 0 : index
    %c0_65 = arith.constant 0 : index
    %130 = vector.load %arg7[%c0_64, %c0_65] : memref<24x512xf32, #tpu.memory_space<vmem>>, vector<16x512xf32>
    %131 = arith.maximumf %123, %130 : vector<16x512xf32>
    %c1_66 = arith.constant 1 : index
    %c0_67 = arith.constant 0 : index
    %132 = vector.load %arg7[%c1_66, %c0_67] : memref<24x512xf32, #tpu.memory_space<vmem>>, vector<16x512xf32>
    %133 = arith.maximumf %131, %132 : vector<16x512xf32>
    %c3_68 = arith.constant 3 : index
    %c0_69 = arith.constant 0 : index
    %134 = vector.load %arg7[%c3_68, %c0_69] : memref<24x512xf32, #tpu.memory_space<vmem>>, vector<16x512xf32>
    %135 = arith.maximumf %133, %134 : vector<16x512xf32>
    %c4_70 = arith.constant 4 : index
    %c0_71 = arith.constant 0 : index
    %136 = vector.load %arg7[%c4_70, %c0_71] : memref<24x512xf32, #tpu.memory_space<vmem>>, vector<16x512xf32>
    %137 = arith.maximumf %135, %136 : vector<16x512xf32>
    %c64_i32_72 = arith.constant 64 : i32
    %138 = tpu.dynamic_rotate %137 by %c64_i32_72 dim 1 : vector<16x512xf32>, i32 -> vector<16x512xf32>
    %139 = vector.broadcast %26 : vector<1x512xf32> to vector<16x512xf32>
    %140 = arith.addf %138, %139 : vector<16x512xf32>
    %141 = arith.maximumf %137, %140 : vector<16x512xf32>
    %c32_i32_73 = arith.constant 32 : i32
    %142 = tpu.dynamic_rotate %137 by %c32_i32_73 dim 1 : vector<16x512xf32>, i32 -> vector<16x512xf32>
    %143 = vector.broadcast %38 : vector<1x512xf32> to vector<16x512xf32>
    %144 = arith.addf %142, %143 : vector<16x512xf32>
    %145 = arith.maximumf %141, %144 : vector<16x512xf32>
    %c480_i32_74 = arith.constant 480 : i32
    %146 = tpu.dynamic_rotate %137 by %c480_i32_74 dim 1 : vector<16x512xf32>, i32 -> vector<16x512xf32>
    %147 = vector.broadcast %50 : vector<1x512xf32> to vector<16x512xf32>
    %148 = arith.addf %146, %147 : vector<16x512xf32>
    %149 = arith.maximumf %145, %148 : vector<16x512xf32>
    %c448_i32_75 = arith.constant 448 : i32
    %150 = tpu.dynamic_rotate %137 by %c448_i32_75 dim 1 : vector<16x512xf32>, i32 -> vector<16x512xf32>
    %151 = vector.broadcast %62 : vector<1x512xf32> to vector<16x512xf32>
    %152 = arith.addf %150, %151 : vector<16x512xf32>
    %153 = arith.maximumf %149, %152 : vector<16x512xf32>
    %154 = arith.truncf %153 : vector<16x512xf32> to vector<16x512xbf16>
    %c3_76 = arith.constant 3 : index
    %c0_77 = arith.constant 0 : index
    %c0_78 = arith.constant 0 : index
    %155 = vector.load %arg4[%c3_76, %c0_77, %c0_78] : memref<4x512x128xbf16, #tpu.memory_space<vmem>>, vector<1x512x128xbf16>
    %156 = vector.shape_cast %155 : vector<1x512x128xbf16> to vector<512x128xbf16>
    %cst_79 = arith.constant dense<0.000000e+00> : vector<16x128xf32>
    %157 = tpu.matmul %154, %156, %cst_79 {dimension_numbers = #tpu.dot_dimension_numbers<[1], [0], [0], [1], [0, 0, 1, 1], [], []>} : vector<16x512xbf16>, vector<512x128xbf16>, vector<16x128xf32> -> vector<16x128xf32>
    %158 = arith.addf %128, %157 : vector<16x128xf32>
    %c0_80 = arith.constant 0 : index
    %c0_81 = arith.constant 0 : index
    %159 = vector.load %arg5[%c0_80, %c0_81] : memref<1x128xf32, #tpu.memory_space<vmem>>, vector<1x128xf32>
    %160 = vector.broadcast %159 : vector<1x128xf32> to vector<16x128xf32>
    %161 = arith.addf %158, %160 : vector<16x128xf32>
    %162 = arith.negf %161 : vector<16x128xf32>
    %163 = math.exp %162 : vector<16x128xf32>
    %cst_82 = arith.constant 1.000000e+00 : f32
    %164 = vector.broadcast %cst_82 : f32 to vector<16x128xf32>
    %165 = arith.addf %164, %163 : vector<16x128xf32>
    %166 = arith.divf %164, %165 : vector<16x128xf32>
    %167 = arith.mulf %161, %166 : vector<16x128xf32>
    %c0_83 = arith.constant 0 : index
    %c0_84 = arith.constant 0 : index
    %c0_85 = arith.constant 0 : index
    %168 = vector.load %arg6[%c0_83, %c0_84, %c0_85] : memref<1x16x128xf32, #tpu.memory_space<vmem>>, vector<1x16x128xf32>
    %169 = vector.shape_cast %168 : vector<1x16x128xf32> to vector<16x128xf32>
    %170 = vector.shape_cast %167 : vector<16x128xf32> to vector<1x16x128xf32>
    tpu.vector_store %arg6[%c0_83, %c0_84, %c0_85], %170 {strides = array<i32>} : memref<1x16x128xf32, #tpu.memory_space<vmem>>, vector<1x16x128xf32>,
    return
  }
  func.func @transform_0(%arg0: i32) -> (i32, i32, i32) {
    %c0_i32 = arith.constant 0 : i32
    %c0_i32_0 = arith.constant 0 : i32
    %c0_i32_1 = arith.constant 0 : i32
    return %arg0, %c0_i32, %c0_i32_0 : i32, i32, i32
  }
  func.func @transform_1(%arg0: i32) -> (i32, i32) {
    %c0_i32 = arith.constant 0 : i32
    %c0_i32_0 = arith.constant 0 : i32
    %c0_i32_1 = arith.constant 0 : i32
    return %c0_i32, %c0_i32_0 : i32, i32
  }
  func.func @transform_2(%arg0: i32) -> (i32, i32) {
    %c0_i32 = arith.constant 0 : i32
    %c0_i32_0 = arith.constant 0 : i32
    %c0_i32_1 = arith.constant 0 : i32
    return %c0_i32, %c0_i32_0 : i32, i32
  }
  func.func @transform_3(%arg0: i32) -> (i32, i32, i32) {
    %c0_i32 = arith.constant 0 : i32
    %c0_i32_0 = arith.constant 0 : i32
    %c0_i32_1 = arith.constant 0 : i32
    %c0_i32_2 = arith.constant 0 : i32
    return %c0_i32, %c0_i32_0, %c0_i32_1 : i32, i32, i32
  }
  func.func @transform_4(%arg0: i32) -> (i32, i32) {
    %c0_i32 = arith.constant 0 : i32
    %c0_i32_0 = arith.constant 0 : i32
    %c0_i32_1 = arith.constant 0 : i32
    return %c0_i32, %c0_i32_0 : i32, i32
  }
  func.func @transform_5(%arg0: i32) -> (i32, i32, i32) {
    %c0_i32 = arith.constant 0 : i32
    %c0_i32_0 = arith.constant 0 : i32
    %c0_i32_1 = arith.constant 0 : i32
    return %arg0, %c0_i32, %c0_i32_0 : i32, i32, i32
  }
}

</mosaic_0001>

<bundles_post_ra>
// kernel: tpu_custom_call.1
= control target key start
LH: loop header
LB: loop body
LE: loop exit
PB: predicated region body
PF: predicated region fallthrough
CT: control target
= control target key end

     0   :  { %10 = vsyncpa [#allocation4], 0  ;;  %s5197_s0 = inlined_call_operand.hbm [shape: f32[2,16,64], index: 0, kind: input, shape index: {}]   ;;  %s5198_s1 = inlined_call_operand.hbm [shape: bf16[64,512], index: 1, kind: input, shape index: {}]   ;;  %s5199_s2 = inlined_call_operand.vmem [shape: f32[1,512], index: 2, kind: input, shape index: {}]   ;;  %s5200_s3 = inlined_call_operand.hbm [shape: bf16[4,512,128], index: 3, kind: input, shape index: {}]   ;;  %s5201_s4 = inlined_call_operand.vmem [shape: f32[1,128], index: 4, kind: input, shape index: {}]   ;;  %s5202_s5 = inlined_call_operand.hbm [shape: f32[2,16,128], index: 5, kind: output, shape index: {}]  }
   0x1   :  { %12 = vsyncpa [#allocation4 + $0x1], 0 }
   0x2   :  { %13 = vsyncpa [#allocation7], 0 }
   0x3   :  { %14 = vsyncpa [#allocation5], 0 }
   0x4   :  { %16 = vsyncpa [#allocation5 + $0x1], 0  ;;  %s4090_s18 = smov 0   ;;  %s4092_s19 = smov 0  }
   0x5   :  { %s4094_s20 = smov 0   ;;  %s4096_s21 = smov 0  }
   0x6 LB: > { %s4111_s22 = sadd.s32 4294967295, %s4041_s21   ;;  %s3230_s23 = sadd.s32 4294967294, %s4041_s21   ;;  %s4041_s21 = sphi %s4096_s21, %s5222_s21   ;;  %s4037_s20 = sphi %s4094_s20, %s5221_s20   ;;  %s4033_s19 = sphi %s4092_s19, %s5220_s19   ;;  %s4029_s18 = sphi %s4090_s18, %s5219_s18  }
   0x7   : > { %p42_p0 = scmp.ne.s32.totalorder %s4033_s19, %s4029_s18  ;;  %p5203_p1 = scmp.eq.s32.totalorder %s4111_s22, 0 }
   0x8   : > { %p156_p3 = scmp.eq.s32.totalorder %s3230_s23, 1  ;;  %p3231_p5 = scmp.ge.s32.totalorder %s4041_s21, 1 }
   0x9   : > { %p4120_p4 = por %p5203_p1, %p42_p0  ;;  %p163_p7 = scmp.lt.s32.totalorder %s4041_s21, 3 }
   0xa   : > { %p4125_p6 = por %p156_p3, %p42_p0  ;;  %s4043_s27 = smov [#allocation6]  }
   0xb   : > { %s5206_s24 = scalar_select %p4120_p4, 1, 0 }
   0xc   : > { %s5207_s25 = scalar_select %p4125_p6, 1, 0 }
   0xd   : > { %p4130_p8 = pnand %p3231_p5, %p163_p7  ;;  %s175_s28 = sshll.u32 %s4043_s27, 4  ;;  %s4134_s28 = int_to_ptr.vmem [resolvable:$true] %s175_s28 }
   0xe   : > { %s4044_s30 = smov [#allocation8]   ;;  %s3885_s9 = scalar_lea.hbm %s5198_s1, 2048 }
   0xf   : > { %p3595_p9 = pneg %p4130_p8  ;;  %s191_s6 = sshll.u32 %s4044_s30, 4  ;;  %s4145_s6 = int_to_ptr.vmem [resolvable:$true] %s191_s6 }
  0x10   : > { %p3886_p12 = scmp.ne.s32.totalorder %s5198_s1, %s3885_s9  ;;  %p3892_p5 = scmp.lt.u32.totalorder %s3885_s9, %s5198_s1 }
  0x11   : > { %p4141_p11 = pnand %p3595_p9, %p5203_p1 }
  0x13   : > { %p3887_p13 = pneg %p4141_p11 }
  0x15   : > { %p3888_p0 = pnand %p3887_p13, %p3886_p12 }
  0x17   : > { %p3889_p3 = pneg %p3888_p0 }
  0x19   : > { %p3894_p7 = pnand %p3892_p5, %p3889_p3 }
  0x1b   : > { %3897 = shalt.err (!%p3894_p7)
}
  0x1c   : > { %s3898_s14 = scalar_lea.vmem %s4134_s28, 2048  ;;  %p3906_p2 = scmp.lt.s32.totalorder %s4134_s28, %s4134_s28 }
  0x1d   : > { %p3899_p9 = scmp.ne.s32.totalorder %s4134_s28, %s3898_s14  ;;  %p3907_p12 = scmp.lt.s32.totalorder %s3898_s14, %s3898_s14 }
  0x1f   : > { %p3901_p10 = pnand %p3899_p9, %p3887_p13  ;;  %p3908_p0 = por %p3907_p12, %p3906_p2 }
  0x21   : > { %p3902_p1 = pneg %p3901_p10 }
  0x23   : > { %p3909_p6 = pnand %p3908_p0, %p3902_p1 }
  0x25   : > { %3912 = shalt.err (!%p3909_p6)
}
  0x26   : > { %s4045_s15 = smov 256   ;;  %s4046_s16 = smov 16  }
  0x27   : > { %3598 = dma.hbm_to_vmem [thread:$0]  (!%p4141_p11), %s5198_s1, 2048, %s4134_s28, [#allocation7], %s4045_s15, %s4045_s15, %s4046_s16  }
  0x28   : > { %s3913_s7 = scalar_lea.hbm %s5200_s3, 16384 }
  0x29   : > { %p3914_p2 = scmp.ne.s32.totalorder %s5200_s3, %s3913_s7  ;;  %p3920_p10 = scmp.lt.u32.totalorder %s3913_s7, %s5200_s3 }
  0x2b   : > { %p3916_p1 = pnand %p3914_p2, %p3887_p13 }
  0x2d   : > { %p3917_p6 = pneg %p3916_p1 }
  0x2f   : > { %p3922_p3 = pnand %p3920_p10, %p3917_p6 }
  0x31   : > { %3925 = shalt.err (!%p3922_p3)
}
  0x32   : > { %s3926_s28 = scalar_lea.vmem %s4145_s6, 16384  ;;  %p3934_p12 = scmp.lt.s32.totalorder %s4145_s6, %s4145_s6 }
  0x33   : > { %p3927_p5 = scmp.ne.s32.totalorder %s4145_s6, %s3926_s28  ;;  %p3935_p0 = scmp.lt.s32.totalorder %s3926_s28, %s3926_s28 }
  0x35   : > { %p3929_p7 = pnand %p3927_p5, %p3887_p13  ;;  %p3936_p2 = por %p3935_p0, %p3934_p12 }
  0x37   : > { %p3930_p9 = pneg %p3929_p7 }
  0x39   : > { %p3937_p1 = pnand %p3936_p2, %p3930_p9 }
  0x3b   : > { %3940 = shalt.err (!%p3937_p1)
}
  0x3c   : > { %s4047_s12 = smov 64   ;;  %s4048_s13 = smov 4  }
  0x3d   : > { %3601 = dma.hbm_to_vmem [thread:$0]  (!%p4141_p11), %s5200_s3, 16384, %s4145_s6, [#allocation7], %s4047_s12, %s4047_s12, %s4048_s13  }
  0x3e   : > { %s4200_s16 = sadd.s32 1, %s4041_s21   ;;  %s29_s23 = sadd.s32 1, %s4037_s20 }
  0x3f   : > { %s26_s17 = ssub.s32 %s4041_s21, %s4200_s16  ;;  %p36_p6 = scmp.ne.s32.totalorder %s4037_s20, %s4033_s19 }
  0x40   : > { %p27_p13 = scmp.eq.s32.totalorder %s26_s17, 0  ;;  %p37_p10 = scmp.eq.s32.totalorder %s4041_s21, 0 }
  0x41   : > { %p5210_p5 = scmp.eq.s32.totalorder %s4111_s22, 1  ;;  %p3612_p9 = scmp.lt.s32.totalorder %s4041_s21, 2 }
  0x42   : > { %s4209_s27 = scalar_select %p27_p13, %s4037_s20, %s29_s23  }
  0x43   : > { %p38_p3 = por %p37_p10, %p36_p6  ;;  %p4213_p7 = por %p5210_p5, %p36_p6 }
  0x44   : > { %s208_s29 = sand.u32 1, %s4037_s20   ;;  %s3405_s6 = sshll.u32 %s4041_s21, 8 }
  0x45   : > { %s5211_s30 = scalar_select %p4213_p7, 1, 0 }
  0x46   : > { %s3235_s7 = sshll.u32 %s208_s29, 4  ;;  %s4223_s10 = scalar_lea.hbm %s5197_s0, %s3405_s6 }
  0x47   : > { %s212_s11 = scalar_lea.vmem [#allocation3], %s3235_s7  ;;  %p4227_p11 = pnand %p3612_p9, %p38_p3 }
  0x48   : > { %s219_s28 = sshll.u32 %s212_s11, 4  ;;  %s4231_s13 = scalar_lea.sflag [#allocation4], %s208_s29  ;;  %s4225_s28 = int_to_ptr.vmem [resolvable:$true] %s219_s28 }
  0x49   : > { %s3941_s14 = scalar_lea.hbm %s4223_s10, 256  ;;  %p3943_p0 = pneg %p4227_p11 }
  0x4a   : > { %p3942_p12 = scmp.ne.s32.totalorder %s4223_s10, %s3941_s14  ;;  %s3946_s23 = scalar_lea.hbm %s5197_s0, 512 }
  0x4b   : > { %p3947_p13 = scmp.lt.u32.totalorder %s4223_s10, %s5197_s0  ;;  %p3948_p6 = scmp.lt.u32.totalorder %s3946_s23, %s3941_s14 }
  0x4c   : > { %p3944_p2 = pnand %p3943_p0, %p3942_p12  ;;  %p3950_p3 = scmp.lt.u32.totalorder %s3941_s14, %s4223_s10 }
  0x4d   : > { %p3949_p10 = por %p3948_p6, %p3947_p13 }
  0x4e   : > { %p3945_p1 = pneg %p3944_p2 }
  0x4f   : > { %p3951_p5 = por %p3950_p3, %p3949_p10 }
  0x51   : > { %p3952_p9 = pnand %p3951_p5, %p3945_p1 }
  0x53   : > { %3955 = shalt.err (!%p3952_p9)
}
  0x54   : > { %s3956_s29 = scalar_lea.vmem %s4225_s28, 256  ;;  %s4049_s8 = smov [#allocation3]  }
  0x55   : > { %p3957_p12 = scmp.ne.s32.totalorder %s4225_s28, %s3956_s29  ;;  %s3961_s9 = sshll.u32 %s4049_s8, 4  ;;  %s3962_s9 = int_to_ptr.vmem [resolvable:$false] %s3961_s9 }
  0x56   : > { %s3963_s11 = scalar_lea.vmem %s3962_s9, 512  ;;  %p3964_p4 = scmp.lt.s32.totalorder %s4225_s28, %s3962_s9 }
  0x57   : > { %p3959_p2 = pnand %p3957_p12, %p3943_p0  ;;  %p3965_p13 = scmp.lt.s32.totalorder %s3963_s11, %s3956_s29 }
  0x59   : > { %p3960_p7 = pneg %p3959_p2  ;;  %p3966_p6 = por %p3965_p13, %p3964_p4 }
  0x5b   : > { %p3967_p10 = pnand %p3966_p6, %p3960_p7 }
  0x5d   : > { %3970 = shalt.err (!%p3967_p10)
}
  0x5e   : > { %s4050_s14 = smov 128   ;;  %s4051_s15 = smov 8  }
  0x5f   : > { %3605 = dma.hbm_to_vmem [thread:$0]  (!%p4227_p11), %s4223_s10, 256, %s4225_s28, %s4231_s13, %s4050_s14, %s4050_s14, %s4051_s15  }
  0x60   : > { %231 = sbr.rel (%p4130_p8) target bundleno = 1179 (0x49b), region = 40  ;;  %s4262_s17 = sand.u32 (!%p4130_p8), 1, %s4033_s19  }
  0x61   : > { %s3239_s23 = sshll.u32 (!%p4130_p8), %s4262_s17, 4  ;;  %s234_s7 = scalar_lea.sflag (!%p4130_p8), [#allocation4], %s4262_s17 }
  0x62   : > { %s4268_s6 = scalar_lea.vmem (!%p4130_p8), [#allocation3], %s3239_s23  ;;  %p5213_p4 = scmp.ne.s32.totalorder (!%p4130_p8), %s5206_s24, 0 }
  0x67   : > { %4016 = dma.done.wait (%p5213_p4), %s234_s7, 256  }
  0x68   : > { %4018 = vsyncadd (%p5213_p4), %s234_s7, 4294967040  ;;  %p5214_p7 = scmp.eq.s32.totalorder %s4111_s22, 0 }
  0x6a   : > { %4020 = dma.done.wait (%p5214_p7), [#allocation7], 18432   ;;  %p5215_p8 = pmov %p5214_p7 }
  0x6b   : > { %v4052_v0 = vmov 0   ;;  %v3693_v1 = vld [vmem:[#allocation6 + $0x4] ss:$16 sps:$4 sm:$0xff]   ;;  %v3695_v2 = vld [vmem:[#allocation6 + $0xc] ss:$16 sps:$4 sm:$0xff]   ;;  %vm394_vm0 = vcmask 523264   ;;  %v294_v21 = vlaneseq }
  0x6c   : > { %4022 = vsyncadd (%p5215_p8), [#allocation7], 4294948864  ;;  %430 = vmatprep.mubr.bf16.mxu0 %v4052_v0  ;;  %473 = vmatprep.mubr.bf16.mxu1 %v4052_v0  ;;  %v3697_v3 = vld [vmem:[#allocation6] ss:$16 sps:$4 sm:$0xff]   ;;  %v3698_v4 = vld [vmem:[#allocation6 + $0x8] ss:$16 sps:$4 sm:$0xff]  }
  0x6d   : > { %398 = vmatprep.subr.bf16.mxu0 %v3693_v1  ;;  %441 = vmatprep.subr.bf16.mxu1 %v3695_v2  ;;  %v3699_v5 = vld [vmem:[#allocation6 + $0x24] ss:$16 sps:$4 sm:$0xff]   ;;  %v3701_v6 = vld [vmem:[#allocation6 + $0x2c] ss:$16 sps:$4 sm:$0xff]   ;;  %v3703_v7 = vld [vmem:[#allocation6 + $0x20] ss:$16 sps:$4 sm:$0xff]  }
  0x6e   : > { %399 = vmatpush1.bf16.msra.mxu0 %v3697_v3  ;;  %442 = vmatpush1.bf16.msra.mxu1 %v3698_v4  ;;  %v3704_v8 = vld [vmem:[#allocation6 + $0x28] ss:$16 sps:$4 sm:$0xff]   ;;  %v3705_v9 = vld [vmem:[#allocation6 + $0x44] ss:$16 sps:$4 sm:$0xff]   ;;  %v3707_v10 = vld [vmem:[#allocation6 + $0x4c] ss:$16 sps:$4 sm:$0xff]  }
  0x6f   : > { %400 = vmatprep.subr.bf16.mxu0 %v3699_v5  ;;  %443 = vmatprep.subr.bf16.mxu1 %v3701_v6  ;;  %v3709_v11 = vld [vmem:[#allocation6 + $0x40] ss:$16 sps:$4 sm:$0xff]   ;;  %v3710_v12 = vld [vmem:[#allocation6 + $0x48] ss:$16 sps:$4 sm:$0xff]   ;;  %v3711_v13 = vld [vmem:[#allocation6 + $0x64] ss:$16 sps:$4 sm:$0xff]  }
  0x70   : > { %v3713_v14 = vld [vmem:[#allocation6 + $0x6c] ss:$16 sps:$4 sm:$0xff]   ;;  %v3715_v15 = vld [vmem:[#allocation6 + $0x60] ss:$16 sps:$4 sm:$0xff]   ;;  %v3716_v16 = vld [vmem:[#allocation6 + $0x68] ss:$16 sps:$4 sm:$0xff]  }
  0x71   : > { %v273_v17 = vld [vmem:[%s4268_s6] sm:$0xff]  ;;  %v274_v18 = vld [vmem:[%s4268_s6 + $0x8] sm:$0xff]  ;;  %v4053_v20 = vmov -inf   ;;  %v295_v22 = vshrl.u32 %v294_v21, 7  ;;  %vm713_vm1 = vcmask 1041408   ;;  %vm790_vm2 = vcmask 1046528  }
  0x72   : > { %401 = vmatpush1.bf16.msra.mxu0 %v3703_v7  ;;  %444 = vmatpush1.bf16.msra.mxu1 %v3704_v8  ;;  %v275_v19 = vpack.c.bf16 %v274_v18, %v273_v17  ;;  %625 = vst [vmem:[#allocation2] sm:$0xff] %v4053_v20  ;;  %626 = vst [vmem:[#allocation2 + $0x8] sm:$0xff] %v4053_v20  ;;  %v292_v25 = vld [vmem:[%s5199_s2] sm:$0xf]  ;;  %vm843_vm3 = vcmask 1044480   ;;  %vm896_vm4 = vcmask 1043456  }
  0x73   : > { %402 = vmatprep.subr.bf16.mxu0 %v3705_v9  ;;  %445 = vmatprep.subr.bf16.mxu1 %v3707_v10  ;;  %627 = vst [vmem:[#allocation2 + $0x10] sm:$0xff] %v4053_v20  ;;  %628 = vst [vmem:[#allocation2 + $0x18] sm:$0xff] %v4053_v20  ;;  %v296_v23 = vsub.s32 0, %v295_v22  ;;  %v304_v24 = vsub.s32 2, %v295_v22  ;;  %v300_v26 = vsub.s32 1, %v295_v22  ;;  %v308_v27 = vsub.s32 3, %v295_v22 }
  0x74   : > { %633 = vst [vmem:[#allocation2 + $0x40] sm:$0xff] %v4053_v20  ;;  %634 = vst [vmem:[#allocation2 + $0x48] sm:$0xff] %v4053_v20  ;;  %s4054_s10 = smov 64   ;;  %s4055_s28 = smov 32  }
  0x75   : > { %635 = vst [vmem:[#allocation2 + $0x50] sm:$0xff] %v4053_v20  ;;  %636 = vst [vmem:[#allocation2 + $0x58] sm:$0xff] %v4053_v20  ;;  %v297_v28 = vrot.slane %v292_v25, %v296_v23  ;;  %v305_v29 = vrot.slane %v292_v25, %v304_v24  ;;  %v301_v30 = vrot.slane %v292_v25, %v300_v26  ;;  %s4056_s12 = smov 96   ;;  %s3406_s8 = sshll.u32 %s4111_s22, 8 }
  0x76   : > { %403 = vmatpush1.bf16.msra.mxu0 %v3709_v11  ;;  %446 = vmatpush1.bf16.msra.mxu1 %v3710_v12  ;;  %v309_v31 = vrot.slane %v292_v25, %v308_v27  ;;  %s271_s9 = scalar_lea.vmem [#allocation9], %s3239_s23  ;;  %s5151_s7 = scalar_lea.hbm %s5202_s5, %s3406_s8 }
  0x77   : > { %404 = vmatprep.subr.bf16.mxu0 %v3711_v13  ;;  %447 = vmatprep.subr.bf16.mxu1 %v3713_v14  ;;  %s3138_s11 = sshll.u32 %s271_s9, 4  ;;  %s3125_s22 = scalar_lea.sflag [#allocation5], %s4262_s17  ;;  %s5153_s11 = int_to_ptr.vmem [resolvable:$true] %s3138_s11 }
  0x78   : > { %s3971_s6 = scalar_lea.vmem %s5153_s11, 256  ;;  %p5216_p0 = scmp.ne.s32.totalorder %s5211_s30, 0 }
  0x79   : > { %p3972_p11 = scmp.ne.s32.totalorder %s5153_s11, %s3971_s6  ;;  %s4057_s23 = smov [#allocation9]  }
  0x7a   : > { %405 = vmatpush1.bf16.msra.mxu0 %v3715_v15  ;;  %448 = vmatpush1.bf16.msra.mxu1 %v3716_v16  ;;  %s3975_s24 = sshll.u32 %s4057_s23, 4  ;;  %s3976_s24 = int_to_ptr.vmem [resolvable:$false] %s3975_s24 }
  0x7b   : > { %p3973_p1 = pnand %p3972_p11, %p5216_p0  ;;  %s3977_s26 = scalar_lea.vmem %s3976_s24, 512 }
  0x7c   : > { %p3978_p5 = scmp.lt.s32.totalorder %s5153_s11, %s3976_s24  ;;  %p3979_p9 = scmp.lt.s32.totalorder %s3977_s26, %s3971_s6 }
  0x7d   : > { %3259 = vmatmul.mubr.msk.bf16.vlgmr.msra.gmra.mrb[0].mxu0 %vm394_vm0, %v275_v19  ;;  %3260 = vmatmul.mubr.msk.bf16.vlgmr.msra.gmra.mrb[0].mxu1 %vm394_vm0, %v275_v19  ;;  %p3974_p3 = pneg %p3973_p1 }
  0x7e   : > { %p3980_p12 = por %p3979_p9, %p3978_p5 }
  0x80   : > { %p3981_p2 = pnand %p3980_p12, %p3974_p3 }
 0x150   : > { %v432_v32 = vpop.f32.mrb[0].mxu0  ;;  %v475_v33 = vpop.f32.mrb[0].mxu1 }
 0x151   : > { %v433_v34 = vadd.f32 %v432_v32, %v297_v28  ;;  %v476_v35 = vadd.f32 %v475_v33, %v305_v29  ;;  %v434_v36 = vpop.f32.mrb[1].mxu0  ;;  %v477_v37 = vpop.f32.mrb[1].mxu1 }
 0x152   : > { %v435_v38 = vadd.f32 %v434_v36, %v301_v30  ;;  %v478_v39 = vadd.f32 %v477_v37, %v309_v31  ;;  %v436_v40 = vpop.f32.mrb[2].mxu0  ;;  %v479_v41 = vpop.f32.mrb[2].mxu1 }
 0x153   : > { %v3261_v42 = vmul.f32 -1.442695, %v433_v34  ;;  %v3263_v43 = vmul.f32 -1.442695, %v476_v35  ;;  %v437_v44 = vadd.f32 %v436_v40, %v297_v28  ;;  %v480_v45 = vadd.f32 %v479_v41, %v305_v29  ;;  %v438_v46 = vpop.f32.mrb[3].mxu0  ;;  %v481_v47 = vpop.f32.mrb[3].mxu1 }
 0x154   : > { %v3262_v48 = vmul.f32 -1.442695, %v435_v38  ;;  %v3264_v49 = vmul.f32 -1.442695, %v478_v39  ;;  %v439_v50 = vadd.f32 %v438_v46, %v301_v30  ;;  %v4292_v51 = vadd.f32 %v481_v47, %v309_v31 }
 0x155   : > { %3845 = vpow2.f32 %v3261_v42  ;;  %v3265_v52 = vmul.f32 -1.442695, %v437_v44  ;;  %v3267_v53 = vmul.f32 -1.442695, %v480_v45 }
 0x156   : > { %3847 = vpow2.f32 %v3263_v43  ;;  %v3266_v54 = vmul.f32 -1.442695, %v439_v50  ;;  %v3268_v55 = vmul.f32 -1.442695, %v4292_v51 }
 0x157   : > { %3849 = vpow2.f32 %v3262_v48 }
 0x158   : > { %3851 = vpow2.f32 %v3264_v49 }
 0x159   : > { %3853 = vpow2.f32 %v3265_v52 }
 0x15a   : > { %3855 = vpow2.f32 %v3267_v53 }
 0x15b   : > { %3857 = vpow2.f32 %v3266_v54 }
 0x15c   : > { %3859 = vpow2.f32 %v3268_v55 }
 0x15f   : > { %v3846_v56 = vpop.eup %3845 }
 0x160   : > { %v3848_v57 = vpop.eup %3847  ;;  %v508_v58 = vadd.f32 1.0, %v3846_v56 }
 0x161   : > { %v3850_v59 = vpop.eup %3849  ;;  %v510_v60 = vadd.f32 1.0, %v3848_v57 }
 0x162   : > { %v3852_v61 = vpop.eup %3851  ;;  %3861 = vrcp.f32 %v508_v58  ;;  %v509_v62 = vadd.f32 1.0, %v3850_v59 }
 0x163   : > { %v3854_v63 = vpop.eup %3853  ;;  %3863 = vrcp.f32 %v510_v60  ;;  %v511_v0 = vadd.f32 1.0, %v3852_v61 }
 0x164   : > { %v3856_v1 = vpop.eup %3855  ;;  %3865 = vrcp.f32 %v509_v62  ;;  %v512_v2 = vadd.f32 1.0, %v3854_v63 }
 0x165   : > { %v3858_v3 = vpop.eup %3857  ;;  %3867 = vrcp.f32 %v511_v0  ;;  %v514_v4 = vadd.f32 1.0, %v3856_v1 }
 0x166   : > { %v3860_v5 = vpop.eup %3859  ;;  %3869 = vrcp.f32 %v512_v2  ;;  %v513_v6 = vadd.f32 1.0, %v3858_v3 }
 0x167   : > { %3871 = vrcp.f32 %v514_v4  ;;  %v515_v7 = vadd.f32 1.0, %v3860_v5 }
 0x168   : > { %3873 = vrcp.f32 %v513_v6 }
 0x169   : > { %3875 = vrcp.f32 %v515_v7 }
 0x16c   : > { %v3862_v8 = vpop.eup %3861 }
 0x16d   : > { %v3864_v9 = vpop.eup %3863  ;;  %v4295_v10 = vmul.f32 %v3862_v8, %v433_v34 }
 0x16e   : > { %v3866_v11 = vpop.eup %3865  ;;  %v4297_v12 = vmul.f32 %v3864_v9, %v476_v35 }
 0x16f   : > { %v3868_v13 = vpop.eup %3867  ;;  %v714_v14 = vrot.slane %v4295_v10, 6  ;;  %v4300_v15 = vmul.f32 %v3866_v11, %v435_v38 }
 0x170   : > { %v3870_v16 = vpop.eup %3869  ;;  %v716_v17 = vrot.slane %v4297_v12, 6  ;;  %v4303_v18 = vmul.f32 %v3868_v13, %v478_v39 }
 0x171   : > { %v3872_v19 = vpop.eup %3871  ;;  %738 = vst [vmem:[#allocation2] sm:$0xfc] %v714_v14  ;;  %v715_v22 = vrot.slane %v4300_v15, 6  ;;  %v4306_v23 = vmul.f32 %v3870_v16, %v437_v44 }
 0x172   : > { %v3874_v24 = vpop.eup %3873  ;;  %740 = vst [vmem:[#allocation2 + $0x10] sm:$0xfc] %v716_v17  ;;  %v717_v25 = vrot.slane %v4303_v18, 6  ;;  %v4309_v26 = vmul.f32 %v3872_v19, %v480_v45 }
 0x173   : > { %v3876_v27 = vpop.eup %3875  ;;  %739 = vst [vmem:[#allocation2 + $0x8] sm:$0xfc] %v715_v22  ;;  %v637_v28 = vpack.c.bf16 %v4306_v23, %v4295_v10  ;;  %v718_v29 = vrot.slane %v4306_v23, 6  ;;  %v4314_v30 = vmul.f32 %v3874_v24, %v439_v50 }
 0x174   : > { %741 = vst [vmem:[#allocation2 + $0x18] sm:$0xfc] %v717_v25  ;;  %v639_v31 = vpack.c.bf16 %v4309_v26, %v4297_v12  ;;  %v722_v32 = vrot.slane %v4309_v26, 6  ;;  %v4320_v33 = vmul.f32 %v3876_v27, %v4292_v51 }
 0x175   : > { %v4323_v34 = vsel %vm713_vm1, %v714_v14, %v718_v29  ;;  %746 = vst [vmem:[#allocation2 + $0x40] sm:$0x3] %v718_v29  ;;  %v720_v35 = vrot.slane %v4314_v30, 6  ;;  %v638_v36 = vpack.c.bf16 %v4314_v30, %v4300_v15 }
 0x176   : > { %v762_v37 = vmax.f32 %v4306_v23, %v4323_v34  ;;  %v4331_v38 = vsel %vm713_vm1, %v716_v17, %v722_v32  ;;  %748 = vst [vmem:[#allocation2 + $0x50] sm:$0x3] %v722_v32  ;;  %v724_v39 = vrot.slane %v4320_v33, 6  ;;  %v792_v40 = vrot.slane %v4323_v34, 1  ;;  %v3789_v23 = vld [vmem:[#allocation8 + $0x2d0] sm:$0xff]  }
 0x177   : > { %v764_v41 = vmax.f32 %v4309_v26, %v4331_v38  ;;  %v4338_v42 = vsel %vm713_vm1, %v715_v22, %v720_v35  ;;  %747 = vst [vmem:[#allocation2 + $0x48] sm:$0x3] %v720_v35  ;;  %v798_v44 = vrot.slane %v4331_v38, 1  ;;  %v851_v47 = vrot.slane %v4331_v38, 3  ;;  %v3787_v26 = vld [vmem:[#allocation8 + $0x288] sm:$0xff]  }
 0x178   : > { %v750_v43 = vld [vmem:[#allocation2] sm:$0xff]  ;;  %v763_v45 = vmax.f32 %v4314_v30, %v4338_v42  ;;  %v4344_v46 = vsel %vm713_vm1, %v717_v25, %v724_v39  ;;  %749 = vst [vmem:[#allocation2 + $0x58] sm:$0x3] %v724_v39  ;;  %v795_v51 = vrot.slane %v4338_v42, 1  ;;  %v904_v57 = vrot.slane %v4331_v38, 4 }
 0x179   : > { %v766_v48 = vld [vmem:[#allocation2] sm:$0xfe]  ;;  %v758_v49 = vmax.f32 %v4295_v10, %v750_v43  ;;  %v4348_v50 = vld [vmem:[#allocation2 + $0x10] sm:$0xff]  ;;  %v765_v52 = vmax.f32 %v4320_v33, %v4344_v46  ;;  %v801_v56 = vrot.slane %v4344_v46, 1  ;;  %v845_v62 = vrot.slane %v4323_v34, 3 }
 0x17a   : > { %v791_v53 = vrot.slane %v766_v48, 1  ;;  %v827_v54 = vld [vmem:[#allocation2] sm:$0xf8]  ;;  %v4353_v55 = vld [vmem:[#allocation2 + $0x8] sm:$0xff]  ;;  %v640_v0 = vpack.c.bf16 %v4320_v33, %v4303_v18  ;;  %v760_v1 = vmax.f32 %v4297_v12, %v4348_v50  ;;  %v898_v5 = vrot.slane %v4323_v34, 4 }
 0x17b   : > { %v844_v58 = vrot.slane %v827_v54, 3  ;;  %v880_v59 = vld [vmem:[#allocation2] sm:$0xf0]  ;;  %v4357_v60 = vld [vmem:[#allocation2 + $0x18] sm:$0xff]  ;;  %v759_v2 = vmax.f32 %v4300_v15, %v4353_v55  ;;  %v829_v54 = vld [vmem:[#allocation2 + $0x10] sm:$0xf8] }
 0x17c   : > { %v793_v61 = vsel %vm790_vm2, %v791_v53, %v792_v40  ;;  %v897_v63 = vrot.slane %v880_v59, 4  ;;  %v774_v3 = vld [vmem:[#allocation2 + $0x40] sm:$0x1]  ;;  %v761_v7 = vmax.f32 %v4303_v18, %v4357_v60  ;;  %v768_v53 = vld [vmem:[#allocation2 + $0x10] sm:$0xfe]  ;;  %v3723_v55 = vld [vmem:[#allocation8 + $0x188] sm:$0xff]  }
 0x17d   : > { %v819_v4 = vmax.f32 %v758_v49, %v793_v61  ;;  %v831_v6 = vld [vmem:[#allocation2 + $0x40] sm:$0x7]  ;;  %v803_v8 = vrot.slane %v774_v3, 1  ;;  %v776_v9 = vld [vmem:[#allocation2 + $0x50] sm:$0x1]  ;;  %v846_v13 = vsel %vm843_vm3, %v844_v58, %v845_v62 }
 0x17e   : > { %v833_v11 = vld [vmem:[#allocation2 + $0x50] sm:$0x7]  ;;  %v856_v14 = vrot.slane %v831_v6, 3  ;;  %v807_v16 = vrot.slane %v776_v9, 1  ;;  %v775_v17 = vld [vmem:[#allocation2 + $0x48] sm:$0x1]  ;;  %v899_v25 = vsel %vm896_vm4, %v897_v63, %v898_v5 }
 0x17f   : > { %v860_v19 = vrot.slane %v833_v11, 3  ;;  %v886_v22 = vld [vmem:[#allocation2 + $0x50] sm:$0xf]  ;;  %v872_v24 = vmax.f32 %v819_v4, %v846_v13  ;;  %v804_v27 = vsel %vm790_vm2, %v792_v40, %v803_v8  ;;  %v805_v29 = vrot.slane %v775_v17, 1  ;;  %v777_v32 = vld [vmem:[#allocation2 + $0x58] sm:$0x1] }
 0x180   : > { %v913_v34 = vrot.slane %v886_v22, 4  ;;  %v857_v35 = vsel %vm843_vm3, %v845_v62, %v856_v14  ;;  %v884_v39 = vld [vmem:[#allocation2 + $0x40] sm:$0xf]  ;;  %v823_v43 = vmax.f32 %v762_v37, %v804_v27  ;;  %v808_v48 = vsel %vm790_vm2, %v798_v44, %v807_v16  ;;  %v882_v60 = vld [vmem:[#allocation2 + $0x10] sm:$0xf0] }
 0x181   : > { %v809_v49 = vrot.slane %v777_v32, 1  ;;  %v861_v50 = vsel %vm843_vm3, %v851_v47, %v860_v19  ;;  %v825_v58 = vmax.f32 %v764_v41, %v808_v48  ;;  %v806_v40 = vsel %vm790_vm2, %v795_v51, %v805_v29  ;;  %v769_v61 = vld [vmem:[#allocation2 + $0x18] sm:$0xfe]  ;;  %v885_v48 = vld [vmem:[#allocation2 + $0x48] sm:$0xf] }
 0x182   : > { %v914_v37 = vsel %vm896_vm4, %v904_v57, %v913_v34  ;;  %v4386_v59 = vmax.f32 %v872_v24, %v899_v25  ;;  %v830_v62 = vld [vmem:[#allocation2 + $0x18] sm:$0xf8]  ;;  %v4388_v63 = vmax.f32 %v763_v45, %v806_v40  ;;  %v876_v41 = vmax.f32 %v823_v43, %v857_v35  ;;  %v834_v19 = vld [vmem:[#allocation2 + $0x58] sm:$0x7]  ;;  %v832_v35 = vld [vmem:[#allocation2 + $0x48] sm:$0x7] }
 0x183   : > { %v810_v3 = vsel %vm790_vm2, %v801_v56, %v809_v49  ;;  %v909_v4 = vrot.slane %v884_v39, 4  ;;  %v878_v8 = vmax.f32 %v825_v58, %v861_v50  ;;  %v797_v9 = vrot.slane %v768_v53, 1  ;;  %v883_v13 = vld [vmem:[#allocation2 + $0x18] sm:$0xf0]  ;;  %v887_v27 = vld [vmem:[#allocation2 + $0x58] sm:$0xf] }
 0x184   : > { %v826_v6 = vmax.f32 %v765_v52, %v810_v3  ;;  %933 = vrot.lane.b32.xlu0 %v4386_v59, %s4054_s10  ;;  %v850_v11 = vrot.slane %v829_v54, 3  ;;  %v903_v16 = vrot.slane %v882_v60, 4  ;;  %v800_v45 = vrot.slane %v769_v61, 1  ;;  %v767_v49 = vld [vmem:[#allocation2 + $0x8] sm:$0xfe] }
 0x185   : > { %v910_v14 = vsel %vm896_vm4, %v898_v5, %v909_v4  ;;  %v853_v17 = vrot.slane %v830_v62, 3  ;;  %v4396_v22 = vmax.f32 %v878_v8, %v914_v37  ;;  %v799_v52 = vsel %vm790_vm2, %v797_v9, %v798_v44  ;;  %v828_v40 = vld [vmem:[#allocation2 + $0x8] sm:$0xf8] }
 0x186   : > { %v4398_v24 = vmax.f32 %v876_v41, %v910_v14  ;;  %v852_v25 = vsel %vm843_vm3, %v850_v11, %v851_v47  ;;  %v821_v29 = vmax.f32 %v760_v1, %v799_v52  ;;  %v905_v5 = vsel %vm896_vm4, %v903_v16, %v904_v57  ;;  %v881_v61 = vld [vmem:[#allocation2 + $0x8] sm:$0xf0]  ;;  %v3717_v16 = vld [vmem:[#allocation8 + $0x1c0] sm:$0xff]  }
 0x187   : > { %v802_v32 = vsel %vm790_vm2, %v800_v45, %v801_v56  ;;  %v854_v34 = vrot.slane %v4344_v46, 3  ;;  %943 = vrot.lane.b32.xlu1 %v4396_v22, %s4054_s10  ;;  %v906_v47 = vrot.slane %v883_v13, 4  ;;  %v907_v1 = vrot.slane %v4344_v46, 4  ;;  %v3718_v45 = vld [vmem:[#allocation8 + $0x140] sm:$0xff]   ;;  %3429 = vmatprep.subr.bf16.mxu1 %v3717_v16 }
 0x188   : > { %935 = vrot.lane.b32.xlu0 %v4398_v24, %s4054_s10  ;;  %v822_v44 = vmax.f32 %v761_v7, %v802_v32  ;;  %v862_v38 = vrot.slane %v834_v19, 3  ;;  %v874_v39 = vmax.f32 %v821_v29, %v852_v25  ;;  %v915_v43 = vrot.slane %v887_v27, 4  ;;  %3407 = vmatprep.subr.bf16.mxu0 %v3718_v45  ;;  %v3720_v25 = vld [vmem:[#allocation8 + $0x100] sm:$0xff]   ;;  %v3721_v27 = vld [vmem:[#allocation8 + $0x1c8] sm:$0xff]   ;;  %v3725_v32 = vld [vmem:[#allocation8 + $0x1d0] sm:$0xff]  }
 0x189   : > { %v855_v57 = vsel %vm843_vm3, %v853_v17, %v854_v34  ;;  %v848_v56 = vrot.slane %v4338_v42, 3  ;;  %v908_v53 = vsel %vm896_vm4, %v906_v47, %v907_v1  ;;  %v858_v58 = vrot.slane %v832_v35, 3  ;;  %v3719_v17 = vld [vmem:[#allocation8 + $0x180] sm:$0xff]   ;;  %v3722_v29 = vld [vmem:[#allocation8 + $0x148] sm:$0xff]   ;;  %3408 = vmatpush3.bf16.msra.mxu0 %v3720_v25  ;;  %v3727_v35 = vld [vmem:[#allocation8 + $0x190] sm:$0xff]  }
 0x18a   : > { %v875_v50 = vmax.f32 %v822_v44, %v855_v57  ;;  %v863_v54 = vsel %vm843_vm3, %v854_v34, %v862_v38  ;;  %v4422_v7 = vmax.f32 %v874_v39, %v905_v5  ;;  %v916_v46 = vsel %vm896_vm4, %v907_v1, %v915_v43  ;;  %3430 = vmatpush3.bf16.msra.mxu1 %v3719_v17  ;;  %v3726_v34 = vld [vmem:[#allocation8 + $0x150] sm:$0xff]   ;;  %v3729_v47 = vld [vmem:[#allocation8 + $0x1d8] sm:$0xff]   ;;  %v3733_v57 = vld [vmem:[#allocation8 + $0x1e0] sm:$0xff]  }
 0x18b   : > { %v879_v37 = vmax.f32 %v826_v6, %v863_v54  ;;  %v901_v60 = vrot.slane %v4338_v42, 4  ;;  %976 = vrot.lane.b32.xlu1 %v4398_v24, %s4055_s28  ;;  %v859_v3 = vsel %vm843_vm3, %v848_v56, %v858_v58  ;;  %v911_v41 = vrot.slane %v885_v48, 4  ;;  %3431 = vmatprep.subr.bf16.mxu1 %v3721_v27  ;;  %v3728_v44 = vld [vmem:[#allocation8 + $0x110] sm:$0xff]   ;;  %v3730_v1 = vld [vmem:[#allocation8 + $0x158] sm:$0xff]   ;;  %v3734_v43 = vld [vmem:[#allocation8 + $0x160] sm:$0xff]  }
 0x18c   : > { %v4428_v62 = vmax.f32 %v875_v50, %v908_v53  ;;  %v794_v4 = vrot.slane %v767_v49, 1  ;;  %941 = vrot.lane.b32.xlu0 %v4422_v7, %s4054_s10  ;;  %v877_v6 = vmax.f32 %v4388_v63, %v859_v3  ;;  %v847_v9 = vrot.slane %v828_v40, 3  ;;  %3409 = vmatprep.subr.bf16.mxu0 %v3722_v29  ;;  %v3731_v38 = vld [vmem:[#allocation8 + $0x198] sm:$0xff]   ;;  %v3737_v48 = vld [vmem:[#allocation8 + $0x1e8] sm:$0xff]   ;;  %v3736_v49 = vld [vmem:[#allocation8 + $0x120] sm:$0xff]  }
 0x18d   : > { %v4433_v8 = vmax.f32 %v879_v37, %v916_v46  ;;  %v912_v11 = vsel %vm896_vm4, %v901_v60, %v911_v41  ;;  %v900_v14 = vrot.slane %v881_v61, 4  ;;  %v3732_v39 = vld [vmem:[#allocation8 + $0x118] sm:$0xff]   ;;  %v3738_v50 = vld [vmem:[#allocation8 + $0x168] sm:$0xff]   ;;  %v3741_v58 = vld [vmem:[#allocation8 + $0x1f0] sm:$0xff]  }
 0x18e   : > { %v796_v13 = vsel %vm790_vm2, %v794_v4, %v795_v51  ;;  %v4440_v19 = vmax.f32 %v877_v6, %v912_v11  ;;  %v849_v63 = vsel %vm843_vm3, %v847_v9, %v848_v56  ;;  %3432 = vmatpush3.bf16.msra.mxu1 %v3723_v55  ;;  %v3735_v56 = vld [vmem:[#allocation8 + $0x1a0] sm:$0xff]   ;;  %v3739_v53 = vld [vmem:[#allocation8 + $0x1a8] sm:$0xff]   ;;  %v3742_v40 = vld [vmem:[#allocation8 + $0x170] sm:$0xff]  }
 0x18f   : > { %v820_v52 = vmax.f32 %v759_v2, %v796_v13  ;;  %984 = vrot.lane.b32.xlu1 %v4396_v22, %s4055_s28  ;;  %v902_v51 = vsel %vm896_vm4, %v900_v14, %v901_v60  ;;  %v3724_v2 = vld [vmem:[#allocation8 + $0x108] sm:$0xff]   ;;  %3433 = vmatprep.subr.bf16.mxu1 %v3725_v32  ;;  %v3743_v37 = vld [vmem:[#allocation8 + $0x1b0] sm:$0xff]   ;;  %v3745_v60 = vld [vmem:[#allocation8 + $0x1f8] sm:$0xff]  }
 0x190   : > { %974 = vrot.lane.b32.xlu0 %v4386_v59, %s4055_s28  ;;  %3410 = vmatpush3.bf16.msra.mxu0 %v3724_v2  ;;  %v3740_v54 = vld [vmem:[#allocation8 + $0x128] sm:$0xff]   ;;  %v3744_v46 = vld [vmem:[#allocation8 + $0x130] sm:$0xff]   ;;  %v3746_v61 = vld [vmem:[#allocation8 + $0x178] sm:$0xff]  }
 0x191   : > { %v873_v42 = vmax.f32 %v820_v52, %v849_v63  ;;  %3411 = vmatprep.subr.bf16.mxu0 %v3726_v34  ;;  %v3747_v3 = vld [vmem:[#allocation8 + $0x1b8] sm:$0xff]   ;;  %v3749_v41 = vld [vmem:[#allocation8 + $0xc0] sm:$0xff]  }
 0x192   : > { %3434 = vmatpush3.bf16.msra.mxu1 %v3727_v35  ;;  %v3748_v4 = vld [vmem:[#allocation8 + $0x138] sm:$0xff]   ;;  %v3750_v6 = vld [vmem:[#allocation8 + $0x40] sm:$0xff]  }
 0x193   : > { %v4451_v5 = vmax.f32 %v873_v42, %v902_v51  ;;  %1017 = vrot.lane.b32.xlu1 %v4398_v24, %s4056_s12  ;;  %3435 = vmatprep.subr.bf16.mxu1 %v3729_v47  ;;  %v4500_v42 = vand.u32 127, %v294_v21 }
 0x194   : > { %982 = vrot.lane.b32.xlu0 %v4422_v7, %s4055_s28  ;;  %3412 = vmatpush3.bf16.msra.mxu0 %v3728_v44 }
 0x195   : > { %3413 = vmatprep.subr.bf16.mxu0 %v3730_v1  ;;  %v544_v27 = vadd.s32 384, %v4500_v42  ;;  %v545_v29 = vadd.s32 4294967232, %v4500_v42  ;;  %vm949_vm5 = vcmp.lt.s32.totalorder %v4500_v42, 64  ;;  %v565_v35 = vadd.s32 4294967264, %v4500_v42 }
 0x196   : > { %3436 = vmatpush3.bf16.msra.mxu1 %v3731_v38  ;;  %vm990_vm7 = vcmp.lt.s32.totalorder %v4500_v42, 32  ;;  %vm1031_vm10 = vcmp.lt.s32.totalorder %v4500_v42, 96 }
 0x197   : > { %945 = vrot.lane.b32.xlu1 %v4428_v62, %s4054_s10  ;;  %3437 = vmatprep.subr.bf16.mxu1 %v3733_v57  ;;  %v588_v32 = vadd.s32 32, %v544_v27  ;;  %v608_v34 = vadd.s32 64, %v544_v27  ;;  %vm549_vm6 = vcmp.ge.s32.totalorder %v545_v29, 0  ;;  %vm569_vm11 = vcmp.ge.s32.totalorder %v565_v35, 0 }
 0x198   : > { %1015 = vrot.lane.b32.xlu0 %v4386_v59, %s4056_s12  ;;  %3414 = vmatpush3.bf16.msra.mxu0 %v3732_v39  ;;  %v4515_v1 = vsel %vm549_vm6, 0.0, %v4053_v20 }
 0x199   : > { %3415 = vmatprep.subr.bf16.mxu0 %v3734_v43  ;;  %vm596_vm8 = vcmp.lt.s32.totalorder %v588_v32, 512  ;;  %vm616_vm9 = vcmp.lt.s32.totalorder %v608_v34, 512 }
 0x19a   : > { %3438 = vmatpush3.bf16.msra.mxu1 %v3735_v56  ;;  %v4522_v43 = vsel %vm596_vm8, 0.0, %v4053_v20  ;;  %v4525_v56 = vsel %vm616_vm9, 0.0, %v4053_v20 }
 0x19b   : > { %947 = vrot.lane.b32.xlu1 %v4433_v8, %s4054_s10  ;;  %3439 = vmatprep.subr.bf16.mxu1 %v3737_v48 }
 0x19c   : > { %986 = vrot.lane.b32.xlu0 %v4428_v62, %s4055_s28  ;;  %3416 = vmatpush3.bf16.msra.mxu0 %v3736_v49 }
 0x19d   : > { %3417 = vmatprep.subr.bf16.mxu0 %v3738_v50 }
 0x19e   : > { %3440 = vmatpush3.bf16.msra.mxu1 %v3739_v53 }
 0x19f   : > { %988 = vrot.lane.b32.xlu1 %v4433_v8, %s4055_s28  ;;  %3441 = vmatprep.subr.bf16.mxu1 %v3741_v58  ;;  %v4539_v58 = vsel %vm569_vm11, 0.0, %v4053_v20 }
 0x1a0   : > { %937 = vrot.lane.b32.xlu0 %v4451_v5, %s4054_s10  ;;  %3418 = vmatpush3.bf16.msra.mxu0 %v3740_v54 }
 0x1a1   : > { %3419 = vmatprep.subr.bf16.mxu0 %v3742_v40 }
 0x1a2   : > { %3442 = vmatpush3.bf16.msra.mxu1 %v3743_v37 }
 0x1a3   : > { %939 = vrot.lane.b32.xlu1 %v4440_v19, %s4054_s10  ;;  %3443 = vmatprep.subr.bf16.mxu1 %v3745_v60 }
 0x1a4   : > { %1027 = vrot.lane.b32.xlu0 %v4428_v62, %s4056_s12  ;;  %3420 = vmatpush3.bf16.msra.mxu0 %v3744_v46 }
 0x1a5   : > { %3421 = vmatprep.subr.bf16.mxu0 %v3746_v61 }
 0x1a6   : > { %3444 = vmatpush3.bf16.msra.mxu1 %v3747_v3 }
 0x1a7   : > { %1029 = vrot.lane.b32.xlu1 %v4433_v8, %s4056_s12  ;;  %3473 = vmatprep.subr.bf16.mxu1 %v3749_v41 }
 0x1a8   : > { %978 = vrot.lane.b32.xlu0 %v4451_v5, %s4055_s28  ;;  %3422 = vmatpush3.bf16.msra.mxu0 %v3748_v4 }
 0x1a9   : > { %3451 = vmatprep.subr.bf16.mxu0 %v3750_v6 }
 0x1ab   : > { %980 = vrot.lane.b32.xlu1 %v4440_v19, %s4055_s28 }
 0x1ac   : > { %1019 = vrot.lane.b32.xlu0 %v4451_v5, %s4056_s12 }
 0x1af   : > { %1021 = vrot.lane.b32.xlu1 %v4440_v19, %s4056_s12 }
 0x1b0   : > { %1023 = vrot.lane.b32.xlu0 %v4422_v7, %s4056_s12 }
 0x1b3   : > { %1025 = vrot.lane.b32.xlu1 %v4396_v22, %s4056_s12 }
 0x1f6   : > { %v934_v9 = vpop.permute.xlu0 %933 }
 0x1f9   : > { %v4487_v11 = vpop.permute.xlu1 %943 }
 0x1fa   : > { %v4489_v13 = vpop.permute.xlu0 %935 }
 0x1fd   : > { %v4491_v14 = vpop.permute.xlu1 %976 }
 0x1fe   : > { %v942_v16 = vpop.permute.xlu0 %941 }
 0x201   : > { %v4493_v45 = vpop.permute.xlu1 %984 }
 0x202   : > { %v4495_v17 = vpop.permute.xlu0 %974 }
 0x205   : > { %v4497_v52 = vpop.permute.xlu1 %1017 }
 0x206   : > { %v983_v63 = vpop.permute.xlu0 %982 }
 0x209   : > { %v946_v51 = vpop.permute.xlu1 %945 }
 0x20a   : > { %v4502_v25 = vpop.permute.xlu0 %1015  ;;  %v4511_v47 = vsel %vm949_vm5, %v942_v16, %v946_v51  ;;  %v956_v38 = vsel %vm949_vm5, %v946_v51, %v934_v9 }
 0x20b   : > { %v969_v48 = vmax.f32 %v4428_v62, %v4511_v47  ;;  %v958_v54 = vadd.f32 %v956_v38, %v4515_v1  ;;  %v1059_v4 = vadd.f32 %v956_v38, %v4525_v56 }
 0x20d   : > { %v948_v55 = vpop.permute.xlu1 %947 }
 0x20e   : > { %v987_v2 = vpop.permute.xlu0 %986  ;;  %v4532_v49 = vsel %vm949_vm5, %v4487_v11, %v948_v55  ;;  %v957_v50 = vsel %vm949_vm5, %v948_v55, %v4489_v13  ;;  %v966_v55 = vmax.f32 %v4386_v59, %v958_v54 }
 0x20f   : > { %v991_v39 = vsel %vm990_vm7, %v983_v63, %v987_v2  ;;  %v997_v40 = vsel %vm990_vm7, %v987_v2, %v4495_v17  ;;  %v962_v61 = vadd.f32 %v957_v50, %v4515_v1  ;;  %v973_v20 = vmax.f32 %v4433_v8, %v4532_v49 }
 0x210   : > { %v1010_v46 = vmax.f32 %v969_v48, %v991_v39  ;;  %v999_v6 = vadd.f32 %v997_v40, %v4539_v58  ;;  %v1063_v2 = vadd.f32 %v957_v50, %v4525_v56 }
 0x211   : > { %v989_v44 = vpop.permute.xlu1 %988  ;;  %v970_v39 = vmax.f32 %v4398_v24, %v962_v61 }
 0x212   : > { %v938_v21 = vpop.permute.xlu0 %937  ;;  %v992_v37 = vsel %vm990_vm7, %v4493_v45, %v989_v44  ;;  %v998_v3 = vsel %vm990_vm7, %v989_v44, %v4491_v14  ;;  %v1007_v24 = vmax.f32 %v966_v55, %v999_v6 }
 0x213   : > { %v1014_v8 = vmax.f32 %v973_v20, %v992_v37  ;;  %v1003_v34 = vadd.f32 %v998_v3, %v4539_v58  ;;  %v952_v35 = vsel %vm949_vm5, %v938_v21, %v942_v16  ;;  %v954_v44 = vsel %vm949_vm5, %v934_v9, %v938_v21 }
 0x215   : > { %v940_v57 = vpop.permute.xlu1 %939 }
 0x216   : > { %v1028_v53 = vpop.permute.xlu0 %1027  ;;  %v953_v59 = vsel %vm949_vm5, %v940_v57, %v4487_v11  ;;  %v955_v48 = vsel %vm949_vm5, %v4489_v13, %v940_v57  ;;  %v968_v11 = vmax.f32 %v4422_v7, %v952_v35 }
 0x217   : > { %v1038_v62 = vsel %vm1031_vm10, %v1028_v53, %v4502_v25  ;;  %v971_v57 = vmax.f32 %v4440_v19, %v955_v48 }
 0x218   : > { %v1043_v60 = vadd.f32 %v1038_v62, %v4522_v43  ;;  %v967_v62 = vmax.f32 %v4451_v5, %v954_v44 }
 0x219   : > { %v1030_v41 = vpop.permute.xlu1 %1029 }
 0x21a   : > { %v1039_v51 = vsel %vm1031_vm10, %v1030_v41, %v4497_v52  ;;  %v1051_v27 = vmax.f32 %v1010_v46, %v1043_v60  ;;  %v979_v29 = vpop.permute.xlu0 %978  ;;  %v1011_v46 = vmax.f32 %v970_v39, %v1003_v34 }
 0x21b   : > { %v1047_v32 = vadd.f32 %v1039_v51, %v4522_v43  ;;  %v993_v16 = vsel %vm990_vm7, %v979_v29, %v983_v63  ;;  %v995_v9 = vsel %vm990_vm7, %v4495_v17, %v979_v29  ;;  %v972_v63 = vmax.f32 %v4396_v22, %v953_v59 }
 0x21c   : > { %v4570_v38 = vmax.f32 %v1051_v27, %v1059_v4  ;;  %v1008_v61 = vmax.f32 %v967_v62, %v995_v9  ;;  %v1009_v20 = vmax.f32 %v968_v11, %v993_v16 }
 0x21d   : > { %v1055_v50 = vmax.f32 %v1014_v8, %v1047_v32  ;;  %v981_v54 = vpop.permute.xlu1 %980 }
 0x21e   : > { %v1700_v40 = vrot.slane %v4570_v38, 6  ;;  %v1020_v21 = vpop.permute.xlu0 %1019  ;;  %v994_v3 = vsel %vm990_vm7, %v981_v54, %v4493_v45  ;;  %v996_v19 = vsel %vm990_vm7, %v4491_v14, %v981_v54 }
 0x21f   : > { %v4587_v37 = vmax.f32 %v1055_v50, %v1063_v2  ;;  %v1036_v13 = vsel %vm1031_vm10, %v4502_v25, %v1020_v21  ;;  %v1013_v2 = vmax.f32 %v972_v63, %v994_v3  ;;  %v3753_v3 = vld [vmem:[#allocation8 + $0xc8] sm:$0xff]  }
 0x220   : > { %1724 = vst [vmem:[#allocation2 + $0x18] sm:$0xfc] %v1700_v40  ;;  %v1048_v60 = vmax.f32 %v1007_v24, %v1036_v13  ;;  %v3751_v13 = vld [vmem:[#allocation8 + $0x80] sm:$0xff]  }
 0x221   : > { %v1707_v17 = vrot.slane %v4587_v37, 6  ;;  %v1022_v5 = vpop.permute.xlu1 %1021  ;;  %v1075_v7 = vpack.c.bf16 %v4587_v37, %v4570_v38 }
 0x222   : > { %v1037_v22 = vsel %vm1031_vm10, %v4497_v52, %v1022_v5  ;;  %v4606_v25 = vmax.f32 %v1048_v60, %v954_v44  ;;  %v1024_v4 = vpop.permute.xlu0 %1023  ;;  %v1012_v52 = vmax.f32 %v971_v57, %v996_v19 }
 0x223   : > { %1732 = vst [vmem:[#allocation2 + $0x58] sm:$0x3] %v1707_v17  ;;  %v4609_v6 = vsel %vm713_vm1, %v1700_v40, %v1707_v17  ;;  %v1052_v51 = vmax.f32 %v1011_v46, %v1037_v22  ;;  %1406 = vmatprep.mubr.bf16.mxu1 %v1075_v7  ;;  %v1032_v45 = vsel %vm1031_vm10, %v1024_v4, %v1028_v53 }
 0x224   : > { %v1034_v27 = vsel %vm1031_vm10, %v1020_v21, %v1024_v4  ;;  %v1697_v14 = vrot.slane %v4606_v25, 6  ;;  %v1050_v55 = vmax.f32 %v1009_v20, %v1032_v45  ;;  %v1783_v34 = vrot.slane %v4609_v6, 1  ;;  %v3754_v45 = vld [vmem:[#allocation8 + $0x48] sm:$0xff]  }
 0x225   : > { %v1049_v29 = vmax.f32 %v1008_v61, %v1034_v27  ;;  %v4616_v8 = vmax.f32 %v1052_v51, %v955_v48  ;;  %v1026_v32 = vpop.permute.xlu1 %1025  ;;  %v1835_v46 = vrot.slane %v4609_v6, 3 }
 0x226   : > { %1721 = vst [vmem:[#allocation2] sm:$0xfc] %v1697_v14  ;;  %v1033_v53 = vsel %vm1031_vm10, %v1026_v32, %v1030_v41  ;;  %v1035_v44 = vsel %vm1031_vm10, %v1022_v5, %v1026_v32  ;;  %v4628_v50 = vmax.f32 %v1050_v55, %v4511_v47  ;;  %v3752_v5 = vld [vmem:[#allocation8] sm:$0xff]  }
 0x227   : > { %v4625_v39 = vmax.f32 %v1049_v29, %v952_v35  ;;  %v1736_v54 = vld [vmem:[#allocation2 + $0x18] sm:$0xff]  ;;  %v1701_v48 = vrot.slane %v4616_v8, 6  ;;  %v1053_v40 = vmax.f32 %v1012_v52, %v1035_v44  ;;  %v1054_v16 = vmax.f32 %v1013_v2, %v1033_v53  ;;  %v3755_v29 = vld [vmem:[#allocation8 + $0x88] sm:$0xff]   ;;  %v3757_v44 = vld [vmem:[#allocation8 + $0xd0] sm:$0xff]  }
 0x228   : > { %v1752_v9 = vld [vmem:[#allocation2 + $0x18] sm:$0xfe]  ;;  %v1744_v21 = vmax.f32 %v4570_v38, %v1736_v54  ;;  %v1699_v41 = vrot.slane %v4628_v50, 6  ;;  %v1072_v7 = vpack.c.bf16 %v4616_v8, %v4606_v25  ;;  %v1887_v52 = vrot.slane %v4609_v6, 4  ;;  %v3756_v53 = vld [vmem:[#allocation8 + $0x8] sm:$0xff]  }
 0x229   : > { %v1812_v24 = vld [vmem:[#allocation2 + $0x18] sm:$0xf8]  ;;  %v1698_v62 = vrot.slane %v4625_v39, 6  ;;  %v1782_v11 = vrot.slane %v1752_v9, 1  ;;  %1729 = vst [vmem:[#allocation2 + $0x40] sm:$0x3] %v1701_v48  ;;  %v4636_v35 = vmax.f32 %v1053_v40, %v953_v59  ;;  %v4639_v47 = vmax.f32 %v1054_v16, %v4532_v49 }
 0x22a   : > { %v1864_v57 = vld [vmem:[#allocation2 + $0x18] sm:$0xf0]  ;;  %1723 = vst [vmem:[#allocation2 + $0x10] sm:$0xfc] %v1699_v41  ;;  %v1834_v38 = vrot.slane %v1812_v24, 3  ;;  %v1748_v2 = vmax.f32 %v4587_v37, %v4609_v6  ;;  %v3758_v9 = vld [vmem:[#allocation8 + $0x50] sm:$0xff]  }
 0x22b   : > { %1722 = vst [vmem:[#allocation2 + $0x8] sm:$0xfc] %v1698_v62  ;;  %v1784_v63 = vsel %vm790_vm2, %v1782_v11, %v1783_v34  ;;  %v1760_v60 = vld [vmem:[#allocation2 + $0x58] sm:$0x1]  ;;  %v1703_v61 = vrot.slane %v4636_v35, 6  ;;  %v1705_v20 = vrot.slane %v4639_v47, 6  ;;  %v1073_v59 = vpack.c.bf16 %v4636_v35, %v4625_v39 }
 0x22c   : > { %v1816_v17 = vld [vmem:[#allocation2 + $0x58] sm:$0x7]  ;;  %v1074_v49 = vpack.c.bf16 %v4639_v47, %v4628_v50  ;;  %v1804_v19 = vmax.f32 %v1744_v21, %v1784_v63  ;;  %v1886_v22 = vrot.slane %v1864_v57, 4  ;;  %v1791_v4 = vrot.slane %v1760_v60, 1  ;;  %v3759_v24 = vld [vmem:[#allocation8 + $0x90] sm:$0xff]  }
 0x22d   : > { %v1868_v51 = vld [vmem:[#allocation2 + $0x58] sm:$0xf]  ;;  %1730 = vst [vmem:[#allocation2 + $0x48] sm:$0x3] %v1703_v61  ;;  %1731 = vst [vmem:[#allocation2 + $0x50] sm:$0x3] %v1705_v20  ;;  %1365 = vmatprep.mubr.bf16.mxu0 %v1073_v59  ;;  %v1836_v55 = vsel %vm843_vm3, %v1834_v38, %v1835_v46  ;;  %v4656_v32 = vsel %vm713_vm1, %v1699_v41, %v1705_v20  ;;  %v4667_v21 = vsel %vm713_vm1, %v1698_v62, %v1703_v61 }
 0x22e   : > { %1407 = vmatmul.mubr.bf16.vlgmr.msra.gmra.mrb[4].mxu1 %v1074_v49  ;;  %v1843_v27 = vrot.slane %v1816_v17, 3  ;;  %1366 = vmatmul.mubr.bf16.vlgmr.msra.gmra.mrb[4].mxu0 %v1072_v7  ;;  %v1856_v54 = vmax.f32 %v1804_v19, %v1836_v55  ;;  %v1792_v40 = vsel %vm790_vm2, %v1783_v34, %v1791_v4  ;;  %v1895_v16 = vrot.slane %v1868_v51, 4  ;;  %v3760_v41 = vld [vmem:[#allocation8 + $0x10] sm:$0xff]   ;;  %v3761_v11 = vld [vmem:[#allocation8 + $0xd8] sm:$0xff]  }
 0x22f   : > { %3474 = vmatpush3.bf16.msra.mxu1 %v3751_v13  ;;  %3452 = vmatpush3.bf16.msra.mxu0 %v3752_v5  ;;  %v1888_v37 = vsel %vm896_vm4, %v1886_v22, %v1887_v52  ;;  %v1808_v6 = vmax.f32 %v1748_v2, %v1792_v40  ;;  %v3762_v57 = vld [vmem:[#allocation8 + $0x58] sm:$0xff]   ;;  %v1777_v20 = vrot.slane %v4667_v21, 1  ;;  %v1832_v59 = vrot.slane %v4656_v32, 3 }
 0x230   : > { %1680 = vmatprep.mubr.bf16.mxu1 %v640_v0  ;;  %1639 = vmatprep.mubr.bf16.mxu0 %v638_v36  ;;  %v4669_v0 = vmax.f32 %v1856_v54, %v1888_v37  ;;  %v1844_v34 = vsel %vm843_vm3, %v1835_v46, %v1843_v27  ;;  %v1780_v36 = vrot.slane %v4656_v32, 1  ;;  %v1896_v17 = vsel %vm896_vm4, %v1887_v52, %v1895_v16  ;;  %v3763_v27 = vld [vmem:[#allocation8 + $0x98] sm:$0xff]   ;;  %v3765_v54 = vld [vmem:[#allocation8 + $0xe0] sm:$0xff]  }
 0x231   : > { %3475 = vmatprep.subr.bf16.mxu1 %v3753_v3  ;;  %v1735_v18 = vld [vmem:[#allocation2 + $0x10] sm:$0xff]  ;;  %3453 = vmatprep.subr.bf16.mxu0 %v3754_v45  ;;  %v1860_v13 = vmax.f32 %v1808_v6, %v1844_v34  ;;  %v1884_v19 = vrot.slane %v4656_v32, 4  ;;  %v3766_v37 = vld [vmem:[#allocation8 + $0x60] sm:$0xff]  }
 0x232   : > { %v1750_v33 = vld [vmem:[#allocation2 + $0x8] sm:$0xfe]  ;;  %v1743_v15 = vmax.f32 %v4628_v50, %v1735_v18  ;;  %v1751_v30 = vld [vmem:[#allocation2 + $0x10] sm:$0xfe]  ;;  %1925 = vrot.lane.b32.xlu0 %v4669_v0, %s4054_s10  ;;  %v1865_v10 = vld [vmem:[#allocation2 + $0x40] sm:$0xf] }
 0x233   : > { %3476 = vmatpush3.bf16.msra.mxu1 %v3755_v29  ;;  %v1811_v63 = vld [vmem:[#allocation2 + $0x10] sm:$0xf8]  ;;  %v1734_v62 = vld [vmem:[#allocation2 + $0x8] sm:$0xff]  ;;  %v1776_v38 = vrot.slane %v1750_v33, 1  ;;  %v1779_v60 = vrot.slane %v1751_v30, 1  ;;  %3454 = vmatpush3.bf16.msra.mxu0 %v3756_v53  ;;  %v4678_v50 = vmax.f32 %v1860_v13, %v1896_v17  ;;  %v1747_v29 = vmax.f32 %v4639_v47, %v4656_v32  ;;  %v3768_v13 = vld [vmem:[#allocation8 + $0x20] sm:$0xff]  }
 0x234   : > { %3477 = vmatprep.subr.bf16.mxu1 %v3757_v44  ;;  %v1831_v61 = vrot.slane %v1811_v63, 3  ;;  %v1863_v46 = vld [vmem:[#allocation2 + $0x10] sm:$0xf0]  ;;  %3455 = vmatprep.subr.bf16.mxu0 %v3758_v9  ;;  %v1759_v49 = vld [vmem:[#allocation2 + $0x50] sm:$0x1]  ;;  %v1742_v51 = vmax.f32 %v4625_v39, %v1734_v62  ;;  %v3764_v44 = vld [vmem:[#allocation8 + $0x18] sm:$0xff]  }
 0x235   : > { %v1815_v5 = vld [vmem:[#allocation2 + $0x50] sm:$0x7]  ;;  %v1781_v7 = vsel %vm790_vm2, %v1779_v60, %v1780_v36  ;;  %v1883_v3 = vrot.slane %v1863_v46, 4  ;;  %v1789_v22 = vrot.slane %v1759_v49, 1  ;;  %1927 = vrot.lane.b32.xlu1 %v4678_v50, %s4054_s10  ;;  %v1810_v52 = vld [vmem:[#allocation2 + $0x8] sm:$0xf8]  ;;  %v1778_v53 = vsel %vm790_vm2, %v1776_v38, %v1777_v20 }
 0x236   : > { %v1867_v4 = vld [vmem:[#allocation2 + $0x50] sm:$0xf]  ;;  %v1803_v45 = vmax.f32 %v1743_v15, %v1781_v7  ;;  %v1841_v55 = vrot.slane %v1815_v5, 3  ;;  %v1758_v2 = vld [vmem:[#allocation2 + $0x48] sm:$0x1]  ;;  %v1833_v39 = vsel %vm843_vm3, %v1831_v61, %v1832_v59  ;;  %v1828_v18 = vrot.slane %v1810_v52, 3 }
 0x237   : > { %3478 = vmatpush3.bf16.msra.mxu1 %v3759_v24  ;;  %3456 = vmatpush3.bf16.msra.mxu0 %v3760_v41  ;;  %v1790_v40 = vsel %vm790_vm2, %v1780_v36, %v1789_v22  ;;  %v1893_v16 = vrot.slane %v1867_v4, 4  ;;  %v1814_v24 = vld [vmem:[#allocation2 + $0x48] sm:$0x7]  ;;  %v1885_v47 = vsel %vm896_vm4, %v1883_v3, %v1884_v19  ;;  %v1787_v33 = vrot.slane %v1758_v2, 1  ;;  %v3767_v41 = vld [vmem:[#allocation8 + $0xa0] sm:$0xff]   ;;  %v3773_v3 = vld [vmem:[#allocation8 + $0xf0] sm:$0xff]  }
 0x238   : > { %3479 = vmatprep.subr.bf16.mxu1 %v3761_v11  ;;  %3457 = vmatprep.subr.bf16.mxu0 %v3762_v57  ;;  %v1855_v6 = vmax.f32 %v1803_v45, %v1833_v39  ;;  %v1807_v9 = vmax.f32 %v1747_v29, %v1790_v40  ;;  %v1842_v32 = vsel %vm843_vm3, %v1832_v59, %v1841_v55  ;;  %v1862_v30 = vld [vmem:[#allocation2 + $0x8] sm:$0xf0]  ;;  %v1829_v62 = vrot.slane %v4667_v21, 3  ;;  %v3775_v29 = vld [vmem:[#allocation8 + $0xb0] sm:$0xff]   ;;  %v3777_v2 = vld [vmem:[#allocation8 + $0xf8] sm:$0xff]  }
 0x239   : > { %v1802_v34 = vmax.f32 %v1742_v51, %v1778_v53  ;;  %v1746_v36 = vmax.f32 %v4636_v35, %v4667_v21  ;;  %v1894_v57 = vsel %vm896_vm4, %v1884_v19, %v1893_v16  ;;  %v3769_v63 = vld [vmem:[#allocation8 + $0xe8] sm:$0xff]   ;;  %v1788_v38 = vsel %vm790_vm2, %v1777_v20, %v1787_v33  ;;  %v3774_v51 = vld [vmem:[#allocation8 + $0x70] sm:$0xff]   ;;  %v1749_v53 = vld [vmem:[#allocation2] sm:$0xfe] }
 0x23a   : > { %v4693_v11 = vmax.f32 %v1855_v6, %v1885_v47  ;;  %v1859_v15 = vmax.f32 %v1807_v9, %v1842_v32  ;;  %v1839_v60 = vrot.slane %v1814_v24, 3  ;;  %v3770_v61 = vld [vmem:[#allocation8 + $0x68] sm:$0xff]   ;;  %v1830_v59 = vsel %vm843_vm3, %v1828_v18, %v1829_v62  ;;  %v3779_v40 = vld [vmem:[#allocation8 + $0xb8] sm:$0xff]   ;;  %v1757_v16 = vld [vmem:[#allocation2 + $0x40] sm:$0x1] }
 0x23b   : > { %3480 = vmatpush3.bf16.msra.mxu1 %v3763_v27  ;;  %3458 = vmatpush3.bf16.msra.mxu0 %v3764_v44  ;;  %v1806_v46 = vmax.f32 %v1746_v36, %v1788_v38  ;;  %v1866_v35 = vld [vmem:[#allocation2 + $0x48] sm:$0xf]  ;;  %v1880_v49 = vrot.slane %v1862_v30, 4  ;;  %v1854_v7 = vmax.f32 %v1802_v34, %v1830_v59  ;;  %v1881_v19 = vrot.slane %v4667_v21, 4  ;;  %v3776_v21 = vld [vmem:[#allocation8 + $0x30] sm:$0xff]   ;;  %v3780_v9 = vld [vmem:[#allocation8 + $0x38] sm:$0xff]  }
 0x23c   : > { %3481 = vmatprep.subr.bf16.mxu1 %v3765_v54  ;;  %3459 = vmatprep.subr.bf16.mxu0 %v3766_v37  ;;  %v4702_v17 = vmax.f32 %v1859_v15, %v1894_v57  ;;  %v3771_v5 = vld [vmem:[#allocation8 + $0xa8] sm:$0xff]   ;;  %v1840_v22 = vsel %vm843_vm3, %v1829_v62, %v1839_v60  ;;  %v1891_v4 = vrot.slane %v1866_v35, 4  ;;  %v3778_v54 = vld [vmem:[#allocation8 + $0x78] sm:$0xff]   ;;  %v4726_v39 = vsel %vm713_vm1, %v1697_v14, %v1701_v48  ;;  %v1733_v37 = vld [vmem:[#allocation2] sm:$0xff] }
 0x23d   : > { %1921 = vrot.lane.b32.xlu0 %v4693_v11, %s4054_s10  ;;  %v3772_v20 = vld [vmem:[#allocation8 + $0x28] sm:$0xff]   ;;  %v1858_v45 = vmax.f32 %v1806_v46, %v1840_v22  ;;  %v1882_v27 = vsel %vm896_vm4, %v1880_v49, %v1881_v19  ;;  %v1773_v6 = vrot.slane %v1749_v53, 1  ;;  %v3781_v24 = vld [vmem:[#allocation8 + $0x2c0] sm:$0xff]   ;;  %v1774_v14 = vrot.slane %v4726_v39, 1  ;;  %v3790_v46 = vld [vmem:[#allocation8 + $0x250] sm:$0xff]  }
 0x23e   : > { %1923 = vrot.lane.b32.xlu1 %v4702_v17, %s4054_s10  ;;  %v4714_v55 = vmax.f32 %v1854_v7, %v1882_v27  ;;  %v1892_v52 = vsel %vm896_vm4, %v1881_v19, %v1891_v4  ;;  %v3782_v47 = vld [vmem:[#allocation8 + $0x240] sm:$0xff]   ;;  %v1785_v48 = vrot.slane %v1757_v16, 1  ;;  %v1741_v32 = vmax.f32 %v4606_v25, %v1733_v37  ;;  %v3785_v30 = vld [vmem:[#allocation8 + $0x2c8] sm:$0xff]   ;;  %v3792_v7 = vld [vmem:[#allocation8 + $0x210] sm:$0xff]  }
 0x23f   : > { %3482 = vmatpush3.bf16.msra.mxu1 %v3767_v41  ;;  %3460 = vmatpush3.bf16.msra.mxu0 %v3768_v13  ;;  %v4719_v44 = vmax.f32 %v1858_v45, %v1892_v52  ;;  %v1809_v18 = vld [vmem:[#allocation2] sm:$0xf8]  ;;  %v1775_v33 = vsel %vm790_vm2, %v1773_v6, %v1774_v14  ;;  %v1813_v15 = vld [vmem:[#allocation2 + $0x40] sm:$0x7]  ;;  %v3786_v13 = vld [vmem:[#allocation8 + $0x248] sm:$0xff]   ;;  %v1745_v62 = vmax.f32 %v4616_v8, %v4726_v39  ;;  %v1826_v38 = vrot.slane %v4726_v39, 3 }
 0x240   : > { %3483 = vmatprep.subr.bf16.mxu1 %v3769_v63  ;;  %3461 = vmatprep.subr.bf16.mxu0 %v3770_v61  ;;  %v3783_v34 = vld [vmem:[#allocation8 + $0x280] sm:$0xff]   ;;  %v1825_v25 = vrot.slane %v1809_v18, 3  ;;  %v1786_v36 = vsel %vm790_vm2, %v1774_v14, %v1785_v48  ;;  %v1801_v57 = vmax.f32 %v1741_v32, %v1775_v33  ;;  %v1837_v12 = vrot.slane %v1813_v15, 3  ;;  %v3794_v22 = vld [vmem:[#allocation8 + $0x258] sm:$0xff]   ;;  %v3804_v16 = vld [vmem:[#allocation8 + $0x228] sm:$0xff]  }
 0x241   : > { %1965 = vrot.lane.b32.xlu0 %v4669_v0, %s4055_s28  ;;  %v3784_v41 = vld [vmem:[#allocation8 + $0x200] sm:$0xff]   ;;  %v1805_v60 = vmax.f32 %v1745_v62, %v1786_v36  ;;  %v1878_v35 = vrot.slane %v4726_v39, 4  ;;  %v1889_v49 = vrot.slane %v1865_v10, 4  ;;  %v3795_v45 = vld [vmem:[#allocation8 + $0x298] sm:$0xff]   ;;  %v3802_v39 = vld [vmem:[#allocation8 + $0x268] sm:$0xff]  }
 0x242   : > { %1967 = vrot.lane.b32.xlu1 %v4678_v50, %s4055_s28  ;;  %v1861_v63 = vld [vmem:[#allocation2] sm:$0xf0]  ;;  %v1838_v59 = vsel %vm843_vm3, %v1826_v38, %v1837_v12  ;;  %v3796_v27 = vld [vmem:[#allocation8 + $0x218] sm:$0xff]   ;;  %v3805_v37 = vld [vmem:[#allocation8 + $0x2f0] sm:$0xff]  }
 0x243   : > { %3484 = vmatpush3.bf16.msra.mxu1 %v3771_v5  ;;  %3462 = vmatpush3.bf16.msra.mxu0 %v3772_v20  ;;  %v1877_v61 = vrot.slane %v1861_v63, 4  ;;  %v3791_v5 = vld [vmem:[#allocation8 + $0x290] sm:$0xff]   ;;  %v1857_v20 = vmax.f32 %v1805_v60, %v1838_v59  ;;  %v3798_v52 = vld [vmem:[#allocation8 + $0x260] sm:$0xff]   ;;  %v3810_v14 = vld [vmem:[#allocation8 + $0x278] sm:$0xff]  }
 0x244   : > { %3485 = vmatprep.subr.bf16.mxu1 %v3773_v3  ;;  %3463 = vmatprep.subr.bf16.mxu0 %v3774_v51  ;;  %v3793_v3 = vld [vmem:[#allocation8 + $0x2d8] sm:$0xff]   ;;  %v1890_v51 = vsel %vm896_vm4, %v1878_v35, %v1889_v49  ;;  %v3800_v53 = vld [vmem:[#allocation8 + $0x220] sm:$0xff]   ;;  %v3806_v6 = vld [vmem:[#allocation8 + $0x270] sm:$0xff]  }
 0x245   : > { %1917 = vrot.lane.b32.xlu0 %v4714_v55, %s4054_s10  ;;  %v1879_v19 = vsel %vm896_vm4, %v1877_v61, %v1878_v35  ;;  %v3811_v48 = vld [vmem:[#allocation8 + $0x2b8] sm:$0xff]  }
 0x246   : > { %1919 = vrot.lane.b32.xlu1 %v4719_v44, %s4054_s10  ;;  %v3812_v32 = vld [vmem:[#allocation8 + $0x238] sm:$0xff]  }
 0x247   : > { %3486 = vmatpush3.bf16.msra.mxu1 %v3775_v29  ;;  %3464 = vmatpush3.bf16.msra.mxu0 %v3776_v21  ;;  %v4768_v29 = vmax.f32 %v1857_v20, %v1890_v51  ;;  %v3797_v21 = vld [vmem:[#allocation8 + $0x2e0] sm:$0xff]  }
 0x248   : > { %3487 = vmatprep.subr.bf16.mxu1 %v3777_v2  ;;  %3465 = vmatprep.subr.bf16.mxu0 %v3778_v54  ;;  %v3799_v2 = vld [vmem:[#allocation8 + $0x2a0] sm:$0xff]   ;;  %v3801_v54 = vld [vmem:[#allocation8 + $0x2e8] sm:$0xff]  }
 0x249   : > { %1961 = vrot.lane.b32.xlu0 %v4693_v11, %s4055_s28 }
 0x24a   : > { %1963 = vrot.lane.b32.xlu1 %v4702_v17, %s4055_s28 }
 0x24b   : > { %3488 = vmatpush3.bf16.msra.mxu1 %v3779_v40  ;;  %3466 = vmatpush3.bf16.msra.mxu0 %v3780_v9  ;;  %v3803_v40 = vld [vmem:[#allocation8 + $0x2a8] sm:$0xff]   ;;  %v3807_v9 = vld [vmem:[#allocation8 + $0x2b0] sm:$0xff]  }
 0x24c   : > { %3517 = vmatprep.subr.bf16.mxu1 %v3781_v24  ;;  %3495 = vmatprep.subr.bf16.mxu0 %v3782_v47  ;;  %v3808_v24 = vld [vmem:[#allocation8 + $0x230] sm:$0xff]   ;;  %v3809_v47 = vld [vmem:[#allocation8 + $0x2f8] sm:$0xff]  }
 0x24d   : > { %2005 = vrot.lane.b32.xlu0 %v4669_v0, %s4056_s12 }
 0x24e   : > { %1681 = vmatmul.mubr.bf16.vlgmr.msra.gmra.mrb[8].mxu1 %v639_v31  ;;  %1640 = vmatmul.mubr.bf16.vlgmr.msra.gmra.mrb[8].mxu0 %v637_v28  ;;  %v3788_v31 = vld [vmem:[#allocation8 + $0x208] sm:$0xff]   ;;  %v1827_v28 = vsel %vm843_vm3, %v1825_v25, %v1826_v38 }
 0x24f   : > { %2007 = vrot.lane.b32.xlu1 %v4678_v50, %s4056_s12  ;;  %3518 = vmatpush3.bf16.msra.mxu1 %v3783_v34  ;;  %v1853_v8 = vmax.f32 %v1801_v57, %v1827_v28 }
 0x250   : > { %3496 = vmatpush3.bf16.msra.mxu0 %v3784_v41  ;;  %3519 = vmatprep.subr.bf16.mxu1 %v3785_v30 }
 0x251   : > { %1957 = vrot.lane.b32.xlu0 %v4714_v55, %s4055_s28  ;;  %3497 = vmatprep.subr.bf16.mxu0 %v3786_v13  ;;  %v4763_v4 = vmax.f32 %v1853_v8, %v1879_v19 }
 0x253   : > { %1959 = vrot.lane.b32.xlu1 %v4719_v44, %s4055_s28  ;;  %3520 = vmatpush3.bf16.msra.mxu1 %v3787_v26 }
 0x254   : > { %3498 = vmatpush3.bf16.msra.mxu0 %v3788_v31  ;;  %3521 = vmatprep.subr.bf16.mxu1 %v3789_v23 }
 0x255   : > { %1997 = vrot.lane.b32.xlu0 %v4714_v55, %s4056_s12  ;;  %3499 = vmatprep.subr.bf16.mxu0 %v3790_v46 }
 0x257   : > { %1999 = vrot.lane.b32.xlu1 %v4719_v44, %s4056_s12  ;;  %3522 = vmatpush3.bf16.msra.mxu1 %v3791_v5 }
 0x258   : > { %3500 = vmatpush3.bf16.msra.mxu0 %v3792_v7  ;;  %3523 = vmatprep.subr.bf16.mxu1 %v3793_v3 }
 0x259   : > { %1913 = vrot.lane.b32.xlu0 %v4763_v4, %s4054_s10  ;;  %3501 = vmatprep.subr.bf16.mxu0 %v3794_v22 }
 0x25b   : > { %1915 = vrot.lane.b32.xlu1 %v4768_v29, %s4054_s10  ;;  %3524 = vmatpush3.bf16.msra.mxu1 %v3795_v45 }
 0x25c   : > { %3502 = vmatpush3.bf16.msra.mxu0 %v3796_v27  ;;  %3525 = vmatprep.subr.bf16.mxu1 %v3797_v21 }
 0x25d   : > { %1953 = vrot.lane.b32.xlu0 %v4763_v4, %s4055_s28  ;;  %3503 = vmatprep.subr.bf16.mxu0 %v3798_v52 }
 0x25f   : > { %1955 = vrot.lane.b32.xlu1 %v4768_v29, %s4055_s28  ;;  %3526 = vmatpush3.bf16.msra.mxu1 %v3799_v2 }
 0x260   : > { %3504 = vmatpush3.bf16.msra.mxu0 %v3800_v53  ;;  %3527 = vmatprep.subr.bf16.mxu1 %v3801_v54 }
 0x261   : > { %1993 = vrot.lane.b32.xlu0 %v4763_v4, %s4056_s12  ;;  %3505 = vmatprep.subr.bf16.mxu0 %v3802_v39 }
 0x263   : > { %1995 = vrot.lane.b32.xlu1 %v4768_v29, %s4056_s12  ;;  %3528 = vmatpush3.bf16.msra.mxu1 %v3803_v40 }
 0x264   : > { %3506 = vmatpush3.bf16.msra.mxu0 %v3804_v16  ;;  %3529 = vmatprep.subr.bf16.mxu1 %v3805_v37 }
 0x265   : > { %2001 = vrot.lane.b32.xlu0 %v4693_v11, %s4056_s12  ;;  %3507 = vmatprep.subr.bf16.mxu0 %v3806_v6 }
 0x267   : > { %2003 = vrot.lane.b32.xlu1 %v4702_v17, %s4056_s12  ;;  %3530 = vmatpush3.bf16.msra.mxu1 %v3807_v9 }
 0x268   : > { %3508 = vmatpush3.bf16.msra.mxu0 %v3808_v24  ;;  %3531 = vmatprep.subr.bf16.mxu1 %v3809_v47 }
 0x269   : > { %3509 = vmatprep.subr.bf16.mxu0 %v3810_v14 }
 0x26b   : > { %3532 = vmatpush3.bf16.msra.mxu1 %v3811_v48 }
 0x26c   : > { %3510 = vmatpush3.bf16.msra.mxu0 %v3812_v32 }
 0x2a4   : > { %v1926_v18 = vpop.permute.xlu0 %1925 }
 0x2a7   : > { %v1928_v33 = vpop.permute.xlu1 %1927 }
 0x2af   : > { %v1922_v34 = vpop.permute.xlu0 %1921 }
 0x2b0   : > { %v1924_v41 = vpop.permute.xlu1 %1923  ;;  %v4790_v60 = vsel %vm949_vm5, %v1922_v34, %v1926_v18 }
 0x2b1   : > { %v4794_v10 = vsel %vm949_vm5, %v1924_v41, %v1928_v33  ;;  %v1948_v61 = vmax.f32 %v4669_v0, %v4790_v60 }
 0x2b2   : > { %v1952_v49 = vmax.f32 %v4678_v50, %v4794_v10 }
 0x2b3   : > { %v1966_v15 = vpop.permute.xlu0 %1965 }
 0x2b4   : > { %v1968_v30 = vpop.permute.xlu1 %1967 }
 0x2b7   : > { %v1918_v25 = vpop.permute.xlu0 %1917 }
 0x2b8   : > { %v1920_v36 = vpop.permute.xlu1 %1919  ;;  %v4806_v8 = vsel %vm949_vm5, %v1918_v25, %v1922_v34 }
 0x2b9   : > { %v4802_v46 = vsel %vm949_vm5, %v1920_v36, %v1924_v41  ;;  %v1947_v45 = vmax.f32 %v4693_v11, %v4806_v8 }
 0x2ba   : > { %v1951_v51 = vmax.f32 %v4702_v17, %v4802_v46 }
 0x2bb   : > { %v1962_v13 = vpop.permute.xlu0 %1961 }
 0x2bc   : > { %v1964_v57 = vpop.permute.xlu1 %1963  ;;  %v1969_v0 = vsel %vm990_vm7, %v1962_v13, %v1966_v15 }
 0x2bd   : > { %v1970_v5 = vsel %vm990_vm7, %v1964_v57, %v1968_v30  ;;  %v1988_v52 = vmax.f32 %v1948_v61, %v1969_v0 }
 0x2be   : > { %v1992_v21 = vmax.f32 %v1952_v49, %v1970_v5 }
 0x2bf   : > { %v2006_v63 = vpop.permute.xlu0 %2005 }
 0x2c1   : > { %v4784_v62 = vpop.permute.xlu1 %2007 }
 0x2c3   : > { %v1958_v38 = vpop.permute.xlu0 %1957 }
 0x2c4   : > { %v1971_v3 = vsel %vm990_vm7, %v1958_v38, %v1962_v13 }
 0x2c5   : > { %v1960_v12 = vpop.permute.xlu1 %1959  ;;  %v1987_v40 = vmax.f32 %v1947_v45, %v1971_v3 }
 0x2c6   : > { %v1972_v20 = vsel %vm990_vm7, %v1960_v12, %v1964_v57 }
 0x2c7   : > { %v1998_v26 = vpop.permute.xlu0 %1997  ;;  %v1991_v39 = vmax.f32 %v1951_v51, %v1972_v20 }
 0x2c9   : > { %v4786_v31 = vpop.permute.xlu1 %1999 }
 0x2cb   : > { %v1914_v23 = vpop.permute.xlu0 %1913 }
 0x2cc   : > { %v1935_v28 = vsel %vm949_vm5, %v1926_v18, %v1914_v23  ;;  %v1933_v50 = vsel %vm949_vm5, %v1914_v23, %v1918_v25 }
 0x2cd   : > { %v1916_v35 = vpop.permute.xlu1 %1915  ;;  %v1937_v59 = vadd.f32 %v1935_v28, %v4515_v1  ;;  %v1946_v16 = vmax.f32 %v4714_v55, %v1933_v50 }
 0x2ce   : > { %v1936_v7 = vsel %vm949_vm5, %v1928_v33, %v1916_v35  ;;  %v1934_v11 = vsel %vm949_vm5, %v1916_v35, %v1920_v36 }
 0x2cf   : > { %v1941_v19 = vadd.f32 %v1936_v7, %v4515_v1  ;;  %v1954_v22 = vpop.permute.xlu0 %1953  ;;  %v1945_v2 = vmax.f32 %v4763_v4, %v1937_v59  ;;  %v2036_v4 = vadd.f32 %v1935_v28, %v4525_v56  ;;  %v1950_v34 = vmax.f32 %v4719_v44, %v1934_v11 }
 0x2d0   : > { %v1975_v27 = vsel %vm990_vm7, %v1966_v15, %v1954_v22  ;;  %v1973_v47 = vsel %vm990_vm7, %v1954_v22, %v1958_v38  ;;  %v2040_v41 = vadd.f32 %v1936_v7, %v4525_v56 }
 0x2d1   : > { %v1956_v53 = vpop.permute.xlu1 %1955  ;;  %v1977_v54 = vadd.f32 %v1975_v27, %v4539_v58  ;;  %v1949_v37 = vmax.f32 %v4768_v29, %v1941_v19  ;;  %v1986_v23 = vmax.f32 %v1946_v16, %v1973_v47 }
 0x2d2   : > { %v1976_v17 = vsel %vm990_vm7, %v1968_v30, %v1956_v53  ;;  %v1974_v48 = vsel %vm990_vm7, %v1956_v53, %v1960_v12 }
 0x2d3   : > { %v1981_v6 = vadd.f32 %v1976_v17, %v4539_v58  ;;  %v1985_v9 = vmax.f32 %v1945_v2, %v1977_v54  ;;  %v1994_v24 = vpop.permute.xlu0 %1993  ;;  %v1990_v12 = vmax.f32 %v1950_v34, %v1974_v48 }
 0x2d4   : > { %v2013_v55 = vsel %vm1031_vm10, %v1994_v24, %v1998_v26  ;;  %v2015_v14 = vsel %vm1031_vm10, %v2006_v63, %v1994_v24 }
 0x2d5   : > { %v1989_v32 = vmax.f32 %v1949_v37, %v1981_v6  ;;  %v1996_v29 = vpop.permute.xlu1 %1995  ;;  %v2020_v18 = vadd.f32 %v2015_v14, %v4522_v43  ;;  %v2025_v33 = vmax.f32 %v1985_v9, %v2013_v55 }
 0x2d6   : > { %v2014_v15 = vsel %vm1031_vm10, %v1996_v29, %v4786_v31  ;;  %v2016_v30 = vsel %vm1031_vm10, %v4784_v62, %v1996_v29 }
 0x2d7   : > { %v2024_v25 = vadd.f32 %v2016_v30, %v4522_v43  ;;  %v2029_v36 = vmax.f32 %v1989_v32, %v2014_v15  ;;  %v2028_v13 = vmax.f32 %v1988_v52, %v2020_v18  ;;  %v4858_v57 = vmax.f32 %v2025_v33, %v1933_v50  ;;  %v2002_v38 = vpop.permute.xlu0 %2001 }
 0x2d8   : > { %v2009_v44 = vsel %vm1031_vm10, %v2002_v38, %v2006_v63  ;;  %v2011_v28 = vsel %vm1031_vm10, %v1998_v26, %v2002_v38 }
 0x2d9   : > { %v2032_v61 = vmax.f32 %v1992_v21, %v2024_v25  ;;  %v4864_v35 = vmax.f32 %v2029_v36, %v1934_v11  ;;  %v4866_v59 = vmax.f32 %v2028_v13, %v2036_v4  ;;  %v2402_v49 = vrot.slane %v4858_v57, 6  ;;  %v2004_v5 = vpop.permute.xlu1 %2003 }
 0x2da   : > { %v2010_v0 = vsel %vm1031_vm10, %v2004_v5, %v4784_v62  ;;  %v2012_v7 = vsel %vm1031_vm10, %v4786_v31, %v2004_v5  ;;  %v2026_v63 = vmax.f32 %v1986_v23, %v2011_v28  ;;  %v2027_v20 = vmax.f32 %v1987_v40, %v2009_v44 }
 0x2db   : > { %v4875_v3 = vmax.f32 %v2032_v61, %v2040_v41  ;;  %v2406_v26 = vrot.slane %v4864_v35, 6  ;;  %v2405_v19 = vrot.slane %v4866_v59, 6  ;;  %2426 = vst [vmem:[#allocation2] sm:$0xfc] %v2402_v49  ;;  %v2030_v50 = vmax.f32 %v1990_v12, %v2012_v7 }
 0x2dc   : > { %v2031_v22 = vmax.f32 %v1991_v39, %v2010_v0  ;;  %v4880_v51 = vmax.f32 %v2026_v63, %v4806_v8  ;;  %v4883_v62 = vmax.f32 %v2027_v20, %v4790_v60  ;;  %v2049_v39 = vpack.c.bf16 %v4864_v35, %v4858_v57 }
 0x2dd   : > { %v2412_v45 = vrot.slane %v4875_v3, 6  ;;  %2434 = vst [vmem:[#allocation2 + $0x40] sm:$0x3] %v2406_v26  ;;  %v4887_v31 = vsel %vm713_vm1, %v2402_v49, %v2406_v26  ;;  %2429 = vst [vmem:[#allocation2 + $0x18] sm:$0xfc] %v2405_v19  ;;  %v4890_v27 = vmax.f32 %v2030_v50, %v4802_v46  ;;  %v2052_v21 = vpack.c.bf16 %v4875_v3, %v4866_v59 }
 0x2de   : > { %v4895_v52 = vmax.f32 %v2031_v22, %v4794_v10  ;;  %v2403_v8 = vrot.slane %v4880_v51, 6  ;;  %v2404_v60 = vrot.slane %v4883_v62, 6  ;;  %v2479_v11 = vrot.slane %v4887_v31, 1 }
 0x2df   : > { %2437 = vst [vmem:[#allocation2 + $0x58] sm:$0x3] %v2412_v45  ;;  %v4900_v2 = vsel %vm713_vm1, %v2405_v19, %v2412_v45  ;;  %v2408_v53 = vrot.slane %v4890_v27, 6  ;;  %2383 = vmatprep.mubr.bf16.mxu1 %v2052_v21  ;;  %v2050_v46 = vpack.c.bf16 %v4890_v27, %v4880_v51 }
 0x2e0   : > { %v2410_v54 = vrot.slane %v4895_v52, 6  ;;  %2427 = vst [vmem:[#allocation2 + $0x8] sm:$0xfc] %v2403_v8  ;;  %2428 = vst [vmem:[#allocation2 + $0x10] sm:$0xfc] %v2404_v60  ;;  %v2051_v10 = vpack.c.bf16 %v4895_v52, %v4883_v62  ;;  %v2488_v37 = vrot.slane %v4900_v2, 1  ;;  %v2453_v41 = vmax.f32 %v4875_v3, %v4900_v2 }
 0x2e1   : > { %2435 = vst [vmem:[#allocation2 + $0x48] sm:$0x3] %v2408_v53  ;;  %v4911_v40 = vsel %vm713_vm1, %v2403_v8, %v2408_v53  ;;  %2342 = vmatprep.mubr.bf16.mxu0 %v2050_v46  ;;  %v2540_v6 = vrot.slane %v4900_v2, 3  ;;  %v2592_v9 = vrot.slane %v4900_v2, 4 }
 0x2e2   : > { %2436 = vst [vmem:[#allocation2 + $0x50] sm:$0x3] %v2410_v54  ;;  %v4914_v16 = vsel %vm713_vm1, %v2404_v60, %v2410_v54  ;;  %2384 = vmatmul.mubr.bf16.vlgmr.msra.gmra.mrb[12].mxu1 %v2051_v10  ;;  %2343 = vmatmul.mubr.bf16.vlgmr.msra.gmra.mrb[12].mxu0 %v2049_v39  ;;  %v4916_v17 = vld [vmem:[#allocation2] sm:$0xfe]  ;;  %v2482_v4 = vrot.slane %v4911_v40, 1  ;;  %v2534_v48 = vrot.slane %v4911_v40, 3  ;;  %v2451_v44 = vmax.f32 %v4890_v27, %v4911_v40 }
 0x2e3   : > { %v2478_v33 = vrot.slane %v4916_v17, 1  ;;  %v2485_v49 = vrot.slane %v4914_v16, 1  ;;  %v2537_v20 = vrot.slane %v4914_v16, 3  ;;  %v2514_v27 = vld [vmem:[#allocation2] sm:$0xf8]  ;;  %v3819_v17 = vld [vmem:[#allocation8 + $0x388] sm:$0xff]  }
 0x2e4   : > { %v2441_v24 = vld [vmem:[#allocation2 + $0x18] sm:$0xff] }
 0x2e5   : > { %v2457_v47 = vld [vmem:[#allocation2 + $0x18] sm:$0xfe]  ;;  %v2449_v14 = vmax.f32 %v4866_v59, %v2441_v24 }
 0x2e6   : > { %v2517_v55 = vld [vmem:[#allocation2 + $0x18] sm:$0xf8]  ;;  %v2487_v32 = vrot.slane %v2457_v47, 1  ;;  %v2465_v15 = vld [vmem:[#allocation2 + $0x58] sm:$0x1]  ;;  %v2452_v47 = vmax.f32 %v4895_v52, %v4914_v16 }
 0x2e7   : > { %v2539_v29 = vrot.slane %v2517_v55, 3  ;;  %v2569_v18 = vld [vmem:[#allocation2 + $0x18] sm:$0xf0]  ;;  %v2521_v30 = vld [vmem:[#allocation2 + $0x58] sm:$0x7]  ;;  %v2439_v25 = vld [vmem:[#allocation2 + $0x8] sm:$0xff] }
 0x2e8   : > { %v2591_v34 = vrot.slane %v2569_v18, 4  ;;  %v2440_v36 = vld [vmem:[#allocation2 + $0x10] sm:$0xff]  ;;  %v2455_v13 = vld [vmem:[#allocation2 + $0x8] sm:$0xfe]  ;;  %v2489_v38 = vsel %vm790_vm2, %v2487_v32, %v2488_v37  ;;  %v2496_v12 = vrot.slane %v2465_v15, 1  ;;  %v2548_v23 = vrot.slane %v2521_v30, 3 }
 0x2e9   : > { %v2448_v28 = vmax.f32 %v4883_v62, %v2440_v36  ;;  %v2456_v61 = vld [vmem:[#allocation2 + $0x10] sm:$0xfe]  ;;  %v2481_v59 = vrot.slane %v2455_v13, 1  ;;  %v2515_v5 = vld [vmem:[#allocation2 + $0x8] sm:$0xf8]  ;;  %v2509_v0 = vmax.f32 %v2449_v14, %v2489_v38  ;;  %v2541_v3 = vsel %vm843_vm3, %v2539_v29, %v2540_v6  ;;  %v3813_v36 = vld [vmem:[#allocation8 + $0x3c0] sm:$0xff]  }
 0x2ea   : > { %v2484_v7 = vrot.slane %v2456_v61, 1  ;;  %v2516_v63 = vld [vmem:[#allocation2 + $0x10] sm:$0xf8]  ;;  %v2497_v26 = vsel %vm790_vm2, %v2488_v37, %v2496_v12  ;;  %v2573_v19 = vld [vmem:[#allocation2 + $0x58] sm:$0xf]  ;;  %v2447_v50 = vmax.f32 %v4880_v51, %v2439_v25  ;;  %v2593_v46 = vsel %vm896_vm4, %v2591_v34, %v2592_v9  ;;  %v3815_v61 = vld [vmem:[#allocation8 + $0x380] sm:$0xff]   ;;  %3561 = vmatprep.subr.bf16.mxu1 %v3813_v36 }
 0x2eb   : > { %v2536_v22 = vrot.slane %v2516_v63, 3  ;;  %v2561_v45 = vmax.f32 %v2509_v0, %v2541_v3  ;;  %v2513_v62 = vmax.f32 %v2453_v41, %v2497_v26  ;;  %v2464_v21 = vld [vmem:[#allocation2 + $0x50] sm:$0x1]  ;;  %v2483_v60 = vsel %vm790_vm2, %v2481_v59, %v2482_v4  ;;  %v2568_v10 = vld [vmem:[#allocation2 + $0x10] sm:$0xf0]  ;;  %v2438_v63 = vld [vmem:[#allocation2] sm:$0xff]  ;;  %3562 = vmatpush3.bf16.msra.mxu1 %v3815_v61 }
 0x2ec   : > { %v2520_v8 = vld [vmem:[#allocation2 + $0x50] sm:$0x7]  ;;  %v2486_v53 = vsel %vm790_vm2, %v2484_v7, %v2485_v49  ;;  %v2549_v54 = vsel %vm843_vm3, %v2540_v6, %v2548_v23  ;;  %v2463_v39 = vld [vmem:[#allocation2 + $0x48] sm:$0x1]  ;;  %v2533_v32 = vrot.slane %v2515_v5, 3  ;;  %v2600_v29 = vrot.slane %v2573_v19, 4 }
 0x2ed   : > { %v2508_v51 = vmax.f32 %v2448_v28, %v2486_v53  ;;  %v4945_v37 = vmax.f32 %v2561_v45, %v2593_v46  ;;  %v2565_v24 = vmax.f32 %v2513_v62, %v2549_v54  ;;  %v2572_v55 = vld [vmem:[#allocation2 + $0x50] sm:$0xf]  ;;  %v2519_v14 = vld [vmem:[#allocation2 + $0x48] sm:$0x7]  ;;  %v2494_v18 = vrot.slane %v2464_v21, 1  ;;  %v3814_v28 = vld [vmem:[#allocation8 + $0x340] sm:$0xff]  }
 0x2ee   : > { %v2546_v41 = vrot.slane %v2520_v8, 3  ;;  %v2507_v15 = vmax.f32 %v2447_v50, %v2483_v60  ;;  %v2538_v34 = vsel %vm843_vm3, %v2536_v22, %v2537_v20  ;;  %v2588_v6 = vrot.slane %v2568_v10, 4  ;;  %v2567_v25 = vld [vmem:[#allocation2 + $0x8] sm:$0xf0]  ;;  %v2571_v23 = vld [vmem:[#allocation2 + $0x48] sm:$0xf]  ;;  %3539 = vmatprep.subr.bf16.mxu0 %v3814_v28 }
 0x2ef   : > { %2630 = vrot.lane.b32.xlu0 %v4945_v37, %s4054_s10  ;;  %v2492_v30 = vrot.slane %v2463_v39, 1  ;;  %v2601_v52 = vsel %vm896_vm4, %v2592_v9, %v2600_v29  ;;  %v2495_v13 = vsel %vm790_vm2, %v2485_v49, %v2494_v18  ;;  %v2598_v38 = vrot.slane %v2572_v55, 4  ;;  %v3817_v54 = vld [vmem:[#allocation8 + $0x3c8] sm:$0xff]   ;;  %v2566_v29 = vld [vmem:[#allocation2] sm:$0xf0]  ;;  %v3822_v18 = vld [vmem:[#allocation8 + $0x350] sm:$0xff]  }
 0x2f0   : > { %v2544_v12 = vrot.slane %v2519_v14, 3  ;;  %v2560_v59 = vmax.f32 %v2508_v51, %v2538_v34  ;;  %v4956_v5 = vmax.f32 %v2565_v24, %v2601_v52  ;;  %v2512_v0 = vmax.f32 %v2452_v47, %v2495_v13  ;;  %3563 = vmatprep.subr.bf16.mxu1 %v3817_v54  ;;  %v3820_v55 = vld [vmem:[#allocation8 + $0x308] sm:$0xff]   ;;  %v2518_v34 = vld [vmem:[#allocation2 + $0x40] sm:$0x7]  ;;  %v3824_v28 = vld [vmem:[#allocation8 + $0x310] sm:$0xff]  }
 0x2f1   : > { %v2589_v7 = vrot.slane %v4914_v16, 4  ;;  %v2535_v2 = vsel %vm843_vm3, %v2533_v32, %v2534_v48  ;;  %v2547_v9 = vsel %vm843_vm3, %v2537_v20, %v2546_v41  ;;  %v2493_v49 = vsel %vm790_vm2, %v2482_v4, %v2492_v30  ;;  %3564 = vmatpush3.bf16.msra.mxu1 %v3819_v17  ;;  %v3826_v61 = vld [vmem:[#allocation8 + $0x358] sm:$0xff]   ;;  %v3833_v54 = vld [vmem:[#allocation8 + $0x3e8] sm:$0xff]  }
 0x2f2   : > { %v2585_v3 = vrot.slane %v2567_v25, 4  ;;  %v2559_v26 = vmax.f32 %v2507_v15, %v2535_v2  ;;  %2632 = vrot.lane.b32.xlu1 %v4956_v5, %s4054_s10  ;;  %v2564_v16 = vmax.f32 %v2512_v0, %v2547_v9  ;;  %v2511_v19 = vmax.f32 %v2451_v44, %v2493_v49  ;;  %v2462_v44 = vld [vmem:[#allocation2 + $0x40] sm:$0x1]  ;;  %v3823_v15 = vld [vmem:[#allocation8 + $0x390] sm:$0xff]   ;;  %v3827_v0 = vld [vmem:[#allocation8 + $0x398] sm:$0xff]  }
 0x2f3   : > { %2670 = vrot.lane.b32.xlu0 %v4945_v37, %s4055_s28  ;;  %v2596_v20 = vrot.slane %v2571_v23, 4  ;;  %v2590_v50 = vsel %vm896_vm4, %v2588_v6, %v2589_v7  ;;  %v2599_v4 = vsel %vm896_vm4, %v2589_v7, %v2598_v38  ;;  %v2545_v22 = vsel %vm843_vm3, %v2534_v48, %v2544_v12  ;;  %v2570_v12 = vld [vmem:[#allocation2 + $0x40] sm:$0xf]  ;;  %v3835_v17 = vld [vmem:[#allocation8 + $0x3a8] sm:$0xff]  }
 0x2f4   : > { %v2586_v45 = vrot.slane %v4911_v40, 4  ;;  %v2446_v62 = vmax.f32 %v4858_v57, %v2438_v63  ;;  %v4980_v21 = vmax.f32 %v2560_v59, %v2590_v50  ;;  %v4982_v8 = vmax.f32 %v2564_v16, %v2599_v4  ;;  %v3816_v40 = vld [vmem:[#allocation8 + $0x300] sm:$0xff]   ;;  %v3818_v57 = vld [vmem:[#allocation8 + $0x348] sm:$0xff]  }
 0x2f5   : > { %v2563_v60 = vmax.f32 %v2511_v19, %v2545_v22  ;;  %v2480_v53 = vsel %vm790_vm2, %v2478_v33, %v2479_v11  ;;  %v3821_v33 = vld [vmem:[#allocation8 + $0x3d0] sm:$0xff]   ;;  %v2530_v24 = vrot.slane %v2514_v27, 3  ;;  %v2490_v47 = vrot.slane %v2462_v44, 1  ;;  %3540 = vmatpush3.bf16.msra.mxu0 %v3816_v40  ;;  %v3830_v16 = vld [vmem:[#allocation8 + $0x360] sm:$0xff]  }
 0x2f6   : > { %v2587_v46 = vsel %vm896_vm4, %v2585_v3, %v2586_v45  ;;  %v2597_v48 = vsel %vm896_vm4, %v2586_v45, %v2596_v20  ;;  %v4993_v10 = vpack.i.bf16 %v4982_v8, %v4980_v21  ;;  %v2506_v14 = vmax.f32 %v2446_v62, %v2480_v53  ;;  %3541 = vmatprep.subr.bf16.mxu0 %v3818_v57  ;;  %v3828_v3 = vld [vmem:[#allocation8 + $0x318] sm:$0xff]   ;;  %v3831_v4 = vld [vmem:[#allocation8 + $0x3a0] sm:$0xff]   ;;  %v3834_v57 = vld [vmem:[#allocation8 + $0x368] sm:$0xff]  }
 0x2f7   : > { %2710 = vrot.lane.b32.xlu0 %v4945_v37, %s4056_s12  ;;  %v4997_v39 = vmax.f32 %v2559_v26, %v2587_v46  ;;  %v4999_v51 = vmax.f32 %v2563_v60, %v2597_v48  ;;  %v2531_v41 = vrot.slane %v4887_v31, 3  ;;  %3565 = vmatprep.subr.bf16.mxu1 %v3821_v33  ;;  %v2582_v30 = vrot.slane %v2566_v29, 4  ;;  %v3829_v26 = vld [vmem:[#allocation8 + $0x3e0] sm:$0xff]   ;;  %v3841_v29 = vld [vmem:[#allocation8 + $0x3f8] sm:$0xff]  }
 0x2f8   : > { %3664 = vrot.lane.b32.xlu1 %v4993_v10, %s4054_s10  ;;  %v2491_v25 = vsel %vm790_vm2, %v2479_v11, %v2490_v47  ;;  %v2450_v52 = vmax.f32 %v4864_v35, %v4887_v31  ;;  %v2583_v13 = vrot.slane %v4887_v31, 4  ;;  %v2542_v38 = vrot.slane %v2518_v34, 3  ;;  %3566 = vmatpush3.bf16.msra.mxu1 %v3823_v15  ;;  %v3825_v11 = vld [vmem:[#allocation8 + $0x3d8] sm:$0xff]   ;;  %v3832_v40 = vld [vmem:[#allocation8 + $0x320] sm:$0xff]   ;;  %v3837_v47 = vld [vmem:[#allocation8 + $0x3f0] sm:$0xff]  }
 0x2f9   : > { %v5005_v32 = vpack.i.bf16 %v4999_v51, %v4997_v39  ;;  %v2532_v6 = vsel %vm843_vm3, %v2530_v24, %v2531_v41  ;;  %3542 = vmatpush3.bf16.msra.mxu0 %v3820_v55  ;;  %v2594_v63 = vrot.slane %v2570_v12, 4  ;;  %3567 = vmatprep.subr.bf16.mxu1 %v3825_v11  ;;  %v3836_v24 = vld [vmem:[#allocation8 + $0x328] sm:$0xff]   ;;  %v3838_v55 = vld [vmem:[#allocation8 + $0x370] sm:$0xff]   ;;  %v3843_v15 = vld [vmem:[#allocation8 + $0x3b8] sm:$0xff]  }
 0x2fa   : > { %v2558_v36 = vmax.f32 %v2506_v14, %v2532_v6  ;;  %3543 = vmatprep.subr.bf16.mxu0 %v3822_v18  ;;  %v2510_v23 = vmax.f32 %v2450_v52, %v2491_v25  ;;  %v2584_v59 = vsel %vm896_vm4, %v2582_v30, %v2583_v13  ;;  %v2543_v7 = vsel %vm843_vm3, %v2531_v41, %v2542_v38  ;;  %v3839_v14 = vld [vmem:[#allocation8 + $0x3b0] sm:$0xff]   ;;  %v3842_v41 = vld [vmem:[#allocation8 + $0x378] sm:$0xff]  }
 0x2fb   : > { %3674 = vrot.lane.b32.xlu0 %v5005_v32, %s4054_s10  ;;  %v2595_v44 = vsel %vm896_vm4, %v2583_v13, %v2594_v63  ;;  %v3840_v18 = vld [vmem:[#allocation8 + $0x330] sm:$0xff]   ;;  %v3844_v34 = vld [vmem:[#allocation8 + $0x338] sm:$0xff]  }
 0x2fc   : > { %2672 = vrot.lane.b32.xlu1 %v4956_v5, %s4055_s28  ;;  %v5024_v35 = vmax.f32 %v2558_v36, %v2584_v59  ;;  %v2562_v49 = vmax.f32 %v2510_v23, %v2543_v7  ;;  %3568 = vmatpush3.bf16.msra.mxu1 %v3827_v0 }
 0x2fd   : > { %3544 = vmatpush3.bf16.msra.mxu0 %v3824_v28  ;;  %3569 = vmatprep.subr.bf16.mxu1 %v3829_v26 }
 0x2fe   : > { %3545 = vmatprep.subr.bf16.mxu0 %v3826_v61  ;;  %v5032_v48 = vmax.f32 %v2562_v49, %v2595_v44 }
 0x2ff   : > { %3679 = vrot.lane.b32.xlu0 %v5005_v32, %s4055_s28 }
 0x300   : > { %3669 = vrot.lane.b32.xlu1 %v4993_v10, %s4055_s28  ;;  %3570 = vmatpush3.bf16.msra.mxu1 %v3831_v4 }
 0x301   : > { %v3445_v31 = vpop.f32.mrb[4].mxu1  ;;  %v3423_v2 = vpop.f32.mrb[4].mxu0  ;;  %3546 = vmatpush3.bf16.msra.mxu0 %v3828_v3  ;;  %3571 = vmatprep.subr.bf16.mxu1 %v3833_v54 }
 0x302   : > { %v3446_v9 = vpop.f32.mrb[5].mxu1  ;;  %v3424_v20 = vpop.f32.mrb[5].mxu0  ;;  %3547 = vmatprep.subr.bf16.mxu0 %v3830_v16 }
 0x303   : > { %2618 = vrot.lane.b32.xlu0 %v5024_v35, %s4054_s10  ;;  %v3447_v19 = vadd.f32 %v3446_v9, %v3445_v31  ;;  %v3448_v50 = vpop.f32.mrb[6].mxu1  ;;  %v3425_v22 = vadd.f32 %v3424_v20, %v3423_v2  ;;  %v3426_v45 = vpop.f32.mrb[6].mxu0 }
 0x304   : > { %2712 = vrot.lane.b32.xlu1 %v4956_v5, %s4056_s12  ;;  %v3449_v62 = vpop.f32.mrb[7].mxu1  ;;  %v3427_v27 = vpop.f32.mrb[7].mxu0  ;;  %3572 = vmatpush3.bf16.msra.mxu1 %v3835_v17 }
 0x305   : > { %v3450_v60 = vadd.f32 %v3449_v62, %v3448_v50  ;;  %v1409_v53 = vadd.f32 %v3447_v19, %v3425_v22  ;;  %v3428_v46 = vadd.f32 %v3427_v27, %v3426_v45  ;;  %3548 = vmatpush3.bf16.msra.mxu0 %v3832_v40  ;;  %3573 = vmatprep.subr.bf16.mxu1 %v3837_v47 }
 0x306   : > { %3549 = vmatprep.subr.bf16.mxu0 %v3834_v57 }
 0x307   : > { %2658 = vrot.lane.b32.xlu0 %v5024_v35, %s4055_s28  ;;  %v1412_v33 = vadd.f32 %v3450_v60, %v3428_v46 }
 0x308   : > { %2620 = vrot.lane.b32.xlu1 %v5032_v48, %s4054_s10  ;;  %3574 = vmatpush3.bf16.msra.mxu1 %v3839_v14 }
 0x309   : > { %3550 = vmatpush3.bf16.msra.mxu0 %v3836_v24  ;;  %3575 = vmatprep.subr.bf16.mxu1 %v3841_v29 }
 0x30a   : > { %3551 = vmatprep.subr.bf16.mxu0 %v3838_v55 }
 0x30b   : > { %2698 = vrot.lane.b32.xlu0 %v5024_v35, %s4056_s12 }
 0x30c   : > { %2660 = vrot.lane.b32.xlu1 %v5032_v48, %s4055_s28  ;;  %3576 = vmatpush3.bf16.msra.mxu1 %v3843_v15 }
 0x30d   : > { %3552 = vmatpush3.bf16.msra.mxu0 %v3840_v18 }
 0x30e   : > { %3553 = vmatprep.subr.bf16.mxu0 %v3842_v41 }
 0x30f   : > { %3684 = vrot.lane.b32.xlu0 %v5005_v32, %s4056_s12 }
 0x310   : > { %2700 = vrot.lane.b32.xlu1 %v5032_v48, %s4056_s12 }
 0x311   : > { %3554 = vmatpush3.bf16.msra.mxu0 %v3844_v34 }
 0x314   : > { %3689 = vrot.lane.b32.xlu1 %v4993_v10, %s4056_s12 }
 0x321   : > { %v3489_v32 = vpop.f32.mrb[8].mxu1  ;;  %v3467_v6 = vpop.f32.mrb[8].mxu0 }
 0x322   : > { %v3490_v30 = vpop.f32.mrb[9].mxu1  ;;  %v3468_v36 = vpop.f32.mrb[9].mxu0 }
 0x323   : > { %v3491_v25 = vadd.f32 %v3490_v30, %v3489_v32  ;;  %v3492_v52 = vpop.f32.mrb[10].mxu1  ;;  %v3469_v13 = vadd.f32 %v3468_v36, %v3467_v6  ;;  %v3470_v38 = vpop.f32.mrb[10].mxu0 }
 0x324   : > { %v3493_v12 = vpop.f32.mrb[11].mxu1  ;;  %v3471_v28 = vpop.f32.mrb[11].mxu0 }
 0x325   : > { %v3494_v23 = vadd.f32 %v3493_v12, %v3492_v52  ;;  %v1642_v11 = vadd.f32 %v3469_v13, %v1409_v53  ;;  %v3472_v61 = vadd.f32 %v3471_v28, %v3470_v38 }
 0x327   : > { %v5048_v59 = vadd.f32 %v3491_v25, %v1642_v11  ;;  %v1645_v0 = vadd.f32 %v3472_v61, %v1412_v33 }
 0x329   : > { %v5050_v31 = vadd.f32 %v3494_v23, %v1645_v0 }
 0x361   : > { %v2631_v10 = vpop.permute.xlu0 %2630 }
 0x364   : > { %v2633_v7 = vpop.permute.xlu1 %2632 }
 0x365   : > { %v2671_v63 = vpop.permute.xlu0 %2670 }
 0x369   : > { %v5052_v2 = vpop.permute.xlu0 %2710 }
 0x36a   : > { %v3665_v9 = vpop.permute.xlu1 %3664 }
 0x36b   : > { %v3667_v20 = vunpack.i.h.bf16 %v3665_v9  ;;  %v3666_v22 = vunpack.i.l.bf16 %v3665_v9 }
 0x36d   : > { %v3675_v49 = vpop.permute.xlu0 %3674  ;;  %v5058_v62 = vsel %vm949_vm5, %v3667_v20, %v2633_v7  ;;  %v5068_v17 = vsel %vm949_vm5, %v3666_v22, %v2631_v10 }
 0x36e   : > { %v2673_v3 = vpop.permute.xlu1 %2672  ;;  %v3676_v50 = vunpack.i.l.bf16 %v3675_v49  ;;  %v3677_v60 = vunpack.i.h.bf16 %v3675_v49  ;;  %v2657_v57 = vmax.f32 %v4956_v5, %v5058_v62  ;;  %v2653_v36 = vmax.f32 %v4945_v37, %v5068_v17 }
 0x370   : > { %v5062_v46 = vsel %vm949_vm5, %v3676_v50, %v3666_v22  ;;  %v5076_v55 = vsel %vm949_vm5, %v3677_v60, %v3667_v20 }
 0x371   : > { %v3680_v26 = vpop.permute.xlu0 %3679  ;;  %v2652_v14 = vmax.f32 %v4980_v21, %v5062_v46  ;;  %v2656_v52 = vmax.f32 %v4982_v8, %v5076_v55 }
 0x372   : > { %v3670_v16 = vpop.permute.xlu1 %3669  ;;  %v3681_v27 = vunpack.i.l.bf16 %v3680_v26  ;;  %v3682_v40 = vunpack.i.h.bf16 %v3680_v26 }
 0x373   : > { %v3672_v44 = vunpack.i.h.bf16 %v3670_v16  ;;  %v3671_v53 = vunpack.i.l.bf16 %v3670_v16 }
 0x375   : > { %v2619_v19 = vpop.permute.xlu0 %2618  ;;  %v2676_v5 = vsel %vm990_vm7, %v3681_v27, %v3671_v53  ;;  %v2675_v18 = vsel %vm990_vm7, %v3672_v44, %v2673_v3  ;;  %v2674_v41 = vsel %vm990_vm7, %v3671_v53, %v2671_v63  ;;  %v2677_v15 = vsel %vm990_vm7, %v3682_v40, %v3672_v44 }
 0x376   : > { %v5054_v4 = vpop.permute.xlu1 %2712  ;;  %v2640_v24 = vsel %vm949_vm5, %v2631_v10, %v2619_v19  ;;  %v2638_v6 = vsel %vm949_vm5, %v2619_v19, %v3676_v50  ;;  %v2692_v13 = vmax.f32 %v2652_v14, %v2676_v5 }
 0x377   : > { %v2642_v30 = vadd.f32 %v2640_v24, %v4515_v1  ;;  %v2651_v0 = vmax.f32 %v4997_v39, %v2638_v6 }
 0x379   : > { %v2659_v45 = vpop.permute.xlu0 %2658  ;;  %v2650_v9 = vmax.f32 %v5024_v35, %v2642_v30 }
 0x37a   : > { %v2621_v54 = vpop.permute.xlu1 %2620  ;;  %v2680_v21 = vsel %vm990_vm7, %v2671_v63, %v2659_v45  ;;  %v2693_v63 = vmax.f32 %v2653_v36, %v2674_v41  ;;  %v2678_v35 = vsel %vm990_vm7, %v2659_v45, %v3681_v27 }
 0x37b   : > { %v2641_v33 = vsel %vm949_vm5, %v2633_v7, %v2621_v54  ;;  %v2682_v28 = vadd.f32 %v2680_v21, %v4539_v58  ;;  %v2697_v7 = vmax.f32 %v2657_v57, %v2675_v18  ;;  %v2639_v37 = vsel %vm949_vm5, %v2621_v54, %v3677_v60 }
 0x37c   : > { %v2646_v32 = vadd.f32 %v2641_v33, %v4515_v1  ;;  %v2696_v1 = vmax.f32 %v2656_v52, %v2677_v15  ;;  %v2655_v20 = vmax.f32 %v4999_v51, %v2639_v37  ;;  %v2745_v50 = vadd.f32 %v2641_v33, %v4525_v56 }
 0x37d   : > { %v2699_v47 = vpop.permute.xlu0 %2698  ;;  %v2691_v14 = vmax.f32 %v2651_v0, %v2678_v35 }
 0x37e   : > { %v2720_v29 = vsel %vm1031_vm10, %v5052_v2, %v2699_v47  ;;  %v2661_v34 = vpop.permute.xlu1 %2660  ;;  %v2654_v8 = vmax.f32 %v5032_v48, %v2646_v32  ;;  %v2690_v48 = vmax.f32 %v2650_v9, %v2682_v28 }
 0x37f   : > { %v2681_v25 = vsel %vm990_vm7, %v2673_v3, %v2661_v34  ;;  %v2725_v38 = vadd.f32 %v2720_v29, %v4522_v43  ;;  %v2679_v16 = vsel %vm990_vm7, %v2661_v34, %v3682_v40 }
 0x380   : > { %v2686_v23 = vadd.f32 %v2681_v25, %v4539_v58 }
 0x381   : > { %v3685_v12 = vpop.permute.xlu0 %3684  ;;  %v2733_v3 = vmax.f32 %v2693_v63, %v2725_v38 }
 0x382   : > { %v3687_v11 = vunpack.i.h.bf16 %v3685_v12  ;;  %v3686_v61 = vunpack.i.l.bf16 %v3685_v12  ;;  %v2701_v10 = vpop.permute.xlu1 %2700  ;;  %v2694_v19 = vmax.f32 %v2654_v8, %v2686_v23 }
 0x383   : > { %v2721_v49 = vsel %vm1031_vm10, %v5054_v4, %v2701_v10 }
 0x384   : > { %v2729_v58 = vadd.f32 %v2721_v49, %v4522_v43  ;;  %v2719_v39 = vsel %vm1031_vm10, %v2701_v10, %v3687_v11  ;;  %v2718_v26 = vsel %vm1031_vm10, %v2699_v47, %v3686_v61  ;;  %v2741_v43 = vadd.f32 %v2640_v24, %v4525_v56 }
 0x385   : > { %v2734_v54 = vmax.f32 %v2694_v19, %v2719_v39  ;;  %v2730_v57 = vmax.f32 %v2690_v48, %v2718_v26  ;;  %v2695_v47 = vmax.f32 %v2655_v20, %v2679_v16 }
 0x386   : > { %v2737_v22 = vmax.f32 %v2697_v7, %v2729_v58  ;;  %v3690_v60 = vpop.permute.xlu1 %3689  ;;  %v2749_v40 = vmax.f32 %v2733_v3, %v2741_v43 }
 0x387   : > { %v3692_v44 = vunpack.i.h.bf16 %v3690_v60  ;;  %v3691_v53 = vunpack.i.l.bf16 %v3690_v60  ;;  %v2746_v41 = vmax.f32 %v2730_v57, %v2638_v6  ;;  %v2750_v15 = vmax.f32 %v2734_v54, %v2639_v37 }
 0x388   : > { %v2753_v5 = vmax.f32 %v2737_v22, %v2745_v50 }
 0x389   : > { %v2715_v45 = vsel %vm1031_vm10, %v3692_v44, %v5054_v4  ;;  %v2714_v51 = vsel %vm1031_vm10, %v3691_v53, %v5052_v2  ;;  %v2717_v56 = vsel %vm1031_vm10, %v3687_v11, %v3692_v44  ;;  %v2716_v27 = vsel %vm1031_vm10, %v3686_v61, %v3691_v53 }
 0x38a   : > { %v2732_v33 = vmax.f32 %v2692_v13, %v2714_v51  ;;  %v2736_v24 = vmax.f32 %v2696_v1, %v2715_v45  ;;  %v2731_v29 = vmax.f32 %v2691_v14, %v2716_v27  ;;  %v2735_v18 = vmax.f32 %v2695_v47, %v2717_v56 }
 0x38b   : > { %v2757_v34 = vpack.c.bf16 %v2753_v5, %v2749_v40  ;;  %v2754_v42 = vpack.c.bf16 %v2750_v15, %v2746_v41 }
 0x38c   : > { %v2748_v21 = vmax.f32 %v2732_v33, %v5068_v17  ;;  %v2752_v4 = vmax.f32 %v2736_v24, %v5058_v62  ;;  %v2747_v32 = vmax.f32 %v2731_v29, %v5062_v46  ;;  %v2751_v2 = vmax.f32 %v2735_v18, %v5076_v55 }
 0x38d   : > { %3088 = vmatprep.mubr.bf16.mxu1 %v2757_v34 }
 0x38e   : > { %v2755_v30 = vpack.c.bf16 %v2751_v2, %v2747_v32  ;;  %v2756_v25 = vpack.c.bf16 %v2752_v4, %v2748_v21 }
 0x390   : > { %3047 = vmatprep.mubr.bf16.mxu0 %v2755_v30  ;;  %3089 = vmatmul.mubr.bf16.vlgmr.msra.gmra.mrb[16].mxu1 %v2756_v25 }
 0x391   : > { %3048 = vmatmul.mubr.bf16.vlgmr.msra.gmra.mrb[16].mxu0 %v2754_v42 }
 0x3b5   : > { %v3533_v36 = vpop.f32.mrb[12].mxu1  ;;  %v3511_v52 = vpop.f32.mrb[12].mxu0 }
 0x3b6   : > { %v3534_v6 = vpop.f32.mrb[13].mxu1  ;;  %v3512_v13 = vpop.f32.mrb[13].mxu0 }
 0x3b7   : > { %v3535_v38 = vadd.f32 %v3534_v6, %v3533_v36  ;;  %v3513_v12 = vadd.f32 %v3512_v13, %v3511_v52  ;;  %v3536_v17 = vpop.f32.mrb[14].mxu1  ;;  %v3514_v23 = vpop.f32.mrb[14].mxu0 }
 0x3b8   : > { %v3537_v62 = vpop.f32.mrb[15].mxu1  ;;  %v3515_v28 = vpop.f32.mrb[15].mxu0 }
 0x3b9   : > { %v2386_v46 = vadd.f32 %v3535_v38, %v3513_v12  ;;  %v3538_v11 = vadd.f32 %v3537_v62, %v3536_v17  ;;  %v3516_v55 = vadd.f32 %v3515_v28, %v3514_v23 }
 0x3bb   : > { %v2392_v61 = vadd.f32 %v2386_v46, %v5048_v59  ;;  %v2389_v1 = vadd.f32 %v3538_v11, %v3516_v55  ;;  %v3397_v59 = vld [vmem:[%s5201_s4] ss:$0 sm:$0xff] }
 0x3bd   : > { %v2393_v0 = vadd.f32 %v2389_v1, %v5050_v31 }
 0x463   : > { %v3577_v10 = vpop.f32.mrb[16].mxu1 }
 0x464   : > { %v3555_v7 = vpop.f32.mrb[16].mxu0  ;;  %v3578_v63 = vpop.f32.mrb[17].mxu1 }
 0x465   : > { %v3579_v37 = vadd.f32 %v3578_v63, %v3577_v10  ;;  %v3556_v8 = vpop.f32.mrb[17].mxu0  ;;  %v3580_v9 = vpop.f32.mrb[18].mxu1 }
 0x466   : > { %v3557_v49 = vadd.f32 %v3556_v8, %v3555_v7  ;;  %v3558_v58 = vpop.f32.mrb[18].mxu0  ;;  %v3581_v3 = vpop.f32.mrb[19].mxu1 }
 0x467   : > { %v3582_v39 = vadd.f32 %v3581_v3, %v3580_v9  ;;  %v3559_v26 = vpop.f32.mrb[19].mxu0 }
 0x468   : > { %v3091_v16 = vadd.f32 %v3579_v37, %v3557_v49  ;;  %v3560_v19 = vadd.f32 %v3559_v26, %v3558_v58 }
 0x46a   : > { %v3097_v35 = vadd.f32 %v3091_v16, %v2392_v61  ;;  %v3094_v31 = vadd.f32 %v3582_v39, %v3560_v19 }
 0x46c   : > { %v3106_v48 = vadd.f32 %v3397_v59, %v3097_v35  ;;  %v3098_v20 = vadd.f32 %v3094_v31, %v2393_v0 }
 0x46e   : > { %v3398_v50 = vmul.f32 -1.442695, %v3106_v48  ;;  %v3107_v43 = vadd.f32 %v3397_v59, %v3098_v20 }
 0x470   : > { %3877 = vpow2.f32 %v3398_v50  ;;  %v3399_v22 = vmul.f32 -1.442695, %v3107_v43 }
 0x472   : > { %3879 = vpow2.f32 %v3399_v22 }
 0x47a   : > { %v3878_v60 = vpop.eup %3877 }
 0x47b   : > { %v3114_v44 = vadd.f32 1.0, %v3878_v60 }
 0x47c   : > { %v3880_v53 = vpop.eup %3879 }
 0x47d   : > { %3881 = vrcp.f32 %v3114_v44  ;;  %v3115_v54 = vadd.f32 1.0, %v3880_v53 }
 0x47f   : > { %3883 = vrcp.f32 %v3115_v54 }
 0x487   : > { %v3882_v57 = vpop.eup %3881 }
 0x488   : > { %v3120_v47 = vmul.f32 %v3882_v57, %v3106_v48 }
 0x489   : > { %v3884_v14 = vpop.eup %3883 }
 0x48a   : > { %3122 = vst [vmem:[%s271_s9] sm:$0xff] %v3120_v47  ;;  %v3121_v40 = vmul.f32 %v3884_v14, %v3107_v43 }
 0x48c   : > { %3123 = vst [vmem:[%s271_s9 + $0x8] sm:$0xff] %v3121_v40 }
 0x48d   : > { %3984 = shalt.err (!%p3981_p2)
}
 0x48e   : > { %s3985_s10 = scalar_lea.hbm %s5151_s7, 256  ;;  %s3989_s13 = scalar_lea.hbm %s5202_s5, 512 }
 0x48f   : > { %p3986_p13 = scmp.ne.s32.totalorder %s5151_s7, %s3985_s10  ;;  %p3990_p4 = scmp.lt.u32.totalorder %s5151_s7, %s5202_s5 }
 0x490   : > { %p3991_p7 = scmp.lt.u32.totalorder %s3989_s13, %s3985_s10  ;;  %p3993_p11 = scmp.lt.u32.totalorder %s3985_s10, %s5151_s7 }
 0x491   : > { %p3987_p6 = pnand %p3986_p13, %p5216_p0 }
 0x492   : > { %p3992_p8 = por %p3991_p7, %p3990_p4 }
 0x493   : > { %p3988_p10 = pneg %p3987_p6 }
 0x494   : > { %p3994_p1 = por %p3993_p11, %p3992_p8 }
 0x496   : > { %p3995_p3 = pnand %p3994_p1, %p3988_p10 }
 0x498   : > { %3998 = shalt.err (!%p3995_p3)
}
 0x499   : > { %s4058_s9 = smov 128   ;;  %s4059_s14 = smov 8  }
 0x49a   : > { %3593 = dma.vmem_to_hbm [thread:$0]  (%p5216_p0), %s5153_s11, 256, %s5151_s7, %s3125_s22, %s4058_s9, %s4058_s9, %s4059_s14  }
 0x49b PF: > { %s3153_s15 = sand.u32 1, %s4029_s18   ;;  %p5217_p5 = scmp.ne.s32.totalorder %s5207_s25, 0 }
 0x49c   : > { %p5218_p9 = scmp.ge.s32.totalorder %s4041_s21, 2  ;;  %s3154_s6 = scalar_lea.sflag [#allocation5], %s3153_s15 }
 0x49e   : > { %p3607_p12 = pnand %p5218_p9, %p5217_p5 }
 0x4a0   : > { %4024 = dma.done.wait (!%p3607_p12), %s3154_s6, 256  }
 0x4a1   : > { %4026 = vsyncadd (!%p3607_p12), %s3154_s6, 4294967040  ;;  %p19_p2 = scmp.ge.s32.totalorder %s4200_s16, 4   ;;  %s5219_s18 = smov %s4033_s19 }
 0x4a2   : > { %s5220_s19 = smov %s4037_s20  ;;  %s5221_s20 = smov %s4209_s27 }
 0x4a3   : > { %s5222_s21 = smov %s4200_s16  ;;  %21 = sbr.rel (!%p19_p2) target bundleno = 6 (0x6), region = 96 }
 0x4aa   :  { %3159 = vsyncpa [#allocation4], 1 }
 0x4ab   :  { %3161 = vsyncpa [#allocation4 + $0x1], 1 }
 0x4ac   :  { %3162 = vsyncpa [#allocation7], 1 }
 0x4ad   :  { %3163 = vsyncpa [#allocation5], 1 }
 0x4ae   :  { %3165 = vsyncpa [#allocation5 + $0x1], 1 }

</bundles_post_ra>
